<compile_context>
chip_gen: v5e
topology: v5e:2x2
jax: 0.10.0
libtpu: 0.0.40
codegen_flags: <defaults>
</compile_context>

<pallas_src>
import functools
import numpy as np
import jax
import jax.numpy as jnp
from jax.experimental import pallas as pl
from jax.experimental.pallas import tpu as pltpu


def _dqnet_kernel(x_ref, mask_ref,
                  wi_ref, wh_ref, bi_ref, bhn_ref,
                  fc1w_ref, fc1b_ref, fc2w_ref, fc2b_ref,
                  amask_ref, out_ref,
                  *, BP, T, A, N, GP, OUT_P):
    # ---- Hoisted input projection: ONE MXU dot over every timestep.
    # x: (T*BP, D) bf16, wi: (D, 3*GP) bf16, f32 accumulation; biases
    # (b_ir+b_hr | b_iz+b_hz | b_in) are folded in, each gate at a 128-lane pitch.
    xi_all = (jnp.dot(x_ref[...], wi_ref[...], preferred_element_type=jnp.float32)
              + bi_ref[...])                              # (T*BP, 3*GP) f32

    wh = wh_ref[...]                                      # (GP, 3*GP) bf16
    bhn = bhn_ref[...]                                    # (1, GP)  f32 (b_hn, zero padded)
    # Hoist the lane broadcast of the freeze mask out of the serial loop.
    upd_all = jnp.broadcast_to(mask_ref[...], (T * BP, GP))

    # ---- Serial GRU recurrence, statically unrolled (T small & static).
    # TODO(synk): if T grows beyond ~16-32 switch to lax.fori_loop(..., unroll=4)
    # and scalar-prefetch max(lengths) to bound the trip count.
    h = jnp.zeros((BP, GP), dtype=jnp.float32)            # lanes >= H stay exactly 0
    for t in range(T):
        r0 = t * BP
        xi_t = xi_all[r0:r0 + BP, :]                      # sublane-aligned row block
        hh = jnp.dot(h.astype(jnp.bfloat16), wh,
                     preferred_element_type=jnp.float32)  # one fused hidden dot
        r = jax.nn.sigmoid(xi_t[:, 0:GP] + hh[:, 0:GP])           # full-tile lane slices
        z = jax.nn.sigmoid(xi_t[:, GP:2 * GP] + hh[:, GP:2 * GP])
        n = jnp.tanh(xi_t[:, 2 * GP:3 * GP] + r * (hh[:, 2 * GP:3 * GP] + bhn))
        h_new = (1.0 - z) * n + z * h
        # Freeze once t >= length(b): frozen value is h_{length-1}, matching
        # x[torch.arange(B), lengths - 1] in the reference.
        upd = upd_all[r0:r0 + BP, :]                      # (BP, GP), 1.0 while t < length
        h = h + upd * (h_new - h)

    # ---- Head: fc1 + ReLU, fc2 (padded to OUT_P lanes), per-action softmax, mask.
    hid = jnp.maximum(
        jnp.dot(h.astype(jnp.bfloat16), fc1w_ref[...],
                preferred_element_type=jnp.float32) + fc1b_ref[...], 0.0)
    logits = (jnp.dot(hid.astype(jnp.bfloat16), fc2w_ref[...],
                      preferred_element_type=jnp.float32) + fc2b_ref[...])   # (BP, OUT_P)

    keep = 1.0 - amask_ref[...]                           # (BP, A): 0.0 where masked
    chunks = []
    for a in range(A):                                    # static tiny loop, off crit path
        la = logits[:, a * N:(a + 1) * N]                 # (BP, N)
        m = jnp.max(la, axis=-1, keepdims=True)
        e = jnp.exp(la - m)
        inv = pl.reciprocal(jnp.sum(e, axis=-1, keepdims=True), approx=True)
        chunks.append((e * inv) * keep[:, a:a + 1])       # masked_fill(action_mask, 0)
    if OUT_P > A * N:
        chunks.append(jnp.zeros((BP, OUT_P - A * N), jnp.float32))
    # Single lane-dense (OUT_P = multiple of 128) unmasked store.
    out_ref[...] = jnp.concatenate(chunks, axis=-1)


def d_qnet_forward(x_btd, lengths, action_mask, params, num_atoms):
    """x_btd: (B, T, obs_dim) padded, batch-first (pad_sequence convention).
    action_mask must be boolean / strictly {0,1} (True = masked)."""
    B, T, D = x_btd.shape
    H = params["fc1_w"].shape[0]
    AN = params["fc2_w"].shape[0]
    A = AN // num_atoms

    BP = -(-B // 8) * 8                       # batch rows padded to a sublane multiple
    GP = -(-H // 128) * 128                   # per-gate lane pitch (>= 128)
    OUT_P = -(-AN // 128) * 128               # lane-dense output width

    # ---- activations: pad batch to BP, flatten time-major so each per-step slice
    # of the hoisted input projection is an (8,128)-aligned contiguous row block.
    xf = x_btd.astype(jnp.float32)
    x_pad = jnp.zeros((BP, T, D), jnp.float32).at[:B].set(xf)
    x_tb = jnp.transpose(x_pad, (1, 0, 2)).reshape(T * BP, D).astype(jnp.bfloat16)

    step_mask = (jnp.arange(T)[None, :] < lengths.astype(jnp.int32)[:, None]
                 ).astype(jnp.float32)                    # (B, T)
    mask_pad = jnp.zeros((BP, T), jnp.float32).at[:B].set(step_mask)
    mask_tb = jnp.transpose(mask_pad, (1, 0)).reshape(T * BP, 1)   # time-major rows

    amask_f = jnp.zeros((BP, A), jnp.float32).at[:B].set(action_mask.astype(jnp.float32))

    # ---- weights: PyTorch GRU layout weight_ih_l0 = [W_ir; W_iz; W_in] (3H, D), etc.
    # Each gate is placed at a 128-lane pitch (r | z | n), zero padded.
    w_ih, w_hh = params["w_ih"], params["w_hh"]
    b_ih, b_hh = params["b_ih"], params["b_hh"]

    wi = jnp.zeros((D, 3 * GP), jnp.float32)
    wh = jnp.zeros((GP, 3 * GP), jnp.float32)             # rows >= H zero (h is lane-padded)
    bi = jnp.zeros((1, 3 * GP), jnp.float32)
    for g in range(3):
        wi = wi.at[:, g * GP:g * GP + H].set(w_ih[g * H:(g + 1) * H].T)
        wh = wh.at[:H, g * GP:g * GP + H].set(w_hh[g * H:(g + 1) * H].T)
    bi = bi.at[0, 0 * GP:0 * GP + H].set(b_ih[0:H] + b_hh[0:H])          # r gate
    bi = bi.at[0, 1 * GP:1 * GP + H].set(b_ih[H:2 * H] + b_hh[H:2 * H])  # z gate
    bi = bi.at[0, 2 * GP:2 * GP + H].set(b_ih[2 * H:3 * H])              # n gate (input only)
    bhn = jnp.zeros((1, GP), jnp.float32).at[0, :H].set(b_hh[2 * H:3 * H])

    fc1w = jnp.zeros((GP, GP), jnp.float32).at[:H, :H].set(params["fc1_w"].T)
    fc1b = jnp.zeros((1, GP), jnp.float32).at[0, :H].set(params["fc1_b"])
    fc2w = jnp.zeros((GP, OUT_P), jnp.float32).at[:H, :AN].set(params["fc2_w"].T)
    fc2b = jnp.zeros((1, OUT_P), jnp.float32).at[0, :AN].set(params["fc2_b"])

    # MXU operands in bf16 (f32 accumulation inside the kernel); biases stay f32.
    wi = wi.astype(jnp.bfloat16)
    wh = wh.astype(jnp.bfloat16)
    fc1w = fc1w.astype(jnp.bfloat16)
    fc2w = fc2w.astype(jnp.bfloat16)

    kern = functools.partial(_dqnet_kernel, BP=BP, T=T, A=A, N=num_atoms,
                             GP=GP, OUT_P=OUT_P)
    vmem = pl.BlockSpec(memory_space=pltpu.MemorySpace.VMEM)
    out_flat = pl.pallas_call(
        kern,
        out_shape=jax.ShapeDtypeStruct((BP, OUT_P), jnp.float32),
        in_specs=[vmem] * 11,
        out_specs=vmem,
    )(x_tb, mask_tb, wi, wh, bi, bhn, fc1w, fc1b, fc2w, fc2b, amask_f)
    return out_flat[:B, :AN].reshape(B, A, num_atoms)


def d_qnet_reference(x_btd, lengths, action_mask, params, num_atoms):
    """Pure-JAX f32 reference mirroring the PyTorch forward."""
    B, T, D = x_btd.shape
    H = params["fc1_w"].shape[0]
    w_ih, w_hh = params["w_ih"], params["w_hh"]
    b_ih, b_hh = params["b_ih"], params["b_hh"]
    wir, wiz, win = [w_ih[i * H:(i + 1) * H] for i in range(3)]
    whr, whz, whn = [w_hh[i * H:(i + 1) * H] for i in range(3)]
    bir, biz, bin_ = [b_ih[i * H:(i + 1) * H] for i in range(3)]
    bhr, bhz, bhn = [b_hh[i * H:(i + 1) * H] for i in range(3)]

    h = jnp.zeros((B, H), jnp.float32)
    hs = []
    for t in range(T):
        x_t = x_btd[:, t, :]
        r = jax.nn.sigmoid(x_t @ wir.T + bir + h @ whr.T + bhr)
        z = jax.nn.sigmoid(x_t @ wiz.T + biz + h @ whz.T + bhz)
        n = jnp.tanh(x_t @ win.T + bin_ + r * (h @ whn.T + bhn))
        h = (1.0 - z) * n + z * h
        hs.append(h)
    hs = jnp.stack(hs, axis=1)                                   # (B, T, H)
    h_last = hs[jnp.arange(B), lengths - 1]                      # (B, H)
    hid = jax.nn.relu(h_last @ params["fc1_w"].T + params["fc1_b"])
    out = hid @ params["fc2_w"].T + params["fc2_b"]
    A = out.shape[-1] // num_atoms
    dist = jax.nn.softmax(out.reshape(B, A, num_atoms), axis=2)
    return jnp.where(action_mask[:, :, None], 0.0, dist)


if __name__ == "__main__":
    # Small shapes consistent with the module.
    B, T = 2, 8
    obs_dim, hidden_dim, action_dim, num_atoms = 8, 32, 4, 8

    key = jax.random.PRNGKey(0)
    ks = jax.random.split(key, 10)
    sc = 0.1
    params = {
        "w_ih":  sc * jax.random.normal(ks[0], (3 * hidden_dim, obs_dim), jnp.float32),
        "w_hh":  sc * jax.random.normal(ks[1], (3 * hidden_dim, hidden_dim), jnp.float32),
        "b_ih":  sc * jax.random.normal(ks[2], (3 * hidden_dim,), jnp.float32),
        "b_hh":  sc * jax.random.normal(ks[3], (3 * hidden_dim,), jnp.float32),
        "fc1_w": sc * jax.random.normal(ks[4], (hidden_dim, hidden_dim), jnp.float32),
        "fc1_b": sc * jax.random.normal(ks[5], (hidden_dim,), jnp.float32),
        "fc2_w": sc * jax.random.normal(ks[6], (action_dim * num_atoms, hidden_dim), jnp.float32),
        "fc2_b": sc * jax.random.normal(ks[7], (action_dim * num_atoms,), jnp.float32),
    }

    # Variable-length sequences, padded batch-first (what pad_sequence produces).
    # NOTE: lengths are assumed >= 1 (same as the PyTorch reference).
    lengths = jnp.array([T, 5], dtype=jnp.int32)
    x = jax.random.normal(ks[8], (B, T, obs_dim), jnp.float32)
    pad_mask = (jnp.arange(T)[None, :] < lengths[:, None]).astype(jnp.float32)
    x = x * pad_mask[:, :, None]          # zero padding region (irrelevant, but clean)

    action_mask = jax.random.bernoulli(ks[9], 0.3, (B, action_dim))  # True = masked

    out = d_qnet_forward(x, lengths, action_mask, params, num_atoms)
    out = jax.block_until_ready(out)

    ref = d_qnet_reference(x, lengths, action_mask, params, num_atoms)
    assert out.shape == (B, action_dim, num_atoms)
    assert np.all(np.isfinite(np.asarray(out)))
    # Tolerance accounts for bf16 MXU operands (accumulation & elementwise stay f32).
    np.testing.assert_allclose(np.asarray(out), np.asarray(ref), atol=5e-3, rtol=5e-3)

    print("KERNEL_OK")
</pallas_src>

<mosaic_0001>
module attributes {stable_mosaic.version = 11 : i64} {
  func.func @_dqnet_kernel(%arg0: memref<64x8xbf16, #tpu.memory_space<vmem>>, %arg1: memref<64x1xf32, #tpu.memory_space<vmem>>, %arg2: memref<8x384xbf16, #tpu.memory_space<vmem>>, %arg3: memref<128x384xbf16, #tpu.memory_space<vmem>>, %arg4: memref<1x384xf32, #tpu.memory_space<vmem>>, %arg5: memref<1x128xf32, #tpu.memory_space<vmem>>, %arg6: memref<128x128xbf16, #tpu.memory_space<vmem>>, %arg7: memref<1x128xf32, #tpu.memory_space<vmem>>, %arg8: memref<128x128xbf16, #tpu.memory_space<vmem>>, %arg9: memref<1x128xf32, #tpu.memory_space<vmem>>, %arg10: memref<8x4xf32, #tpu.memory_space<vmem>>, %arg11: memref<8x128xf32, #tpu.memory_space<vmem>>) attributes {dimension_semantics = [], scalar_prefetch = 0 : i64, scratch_operands = 0 : i64, tpu.core_type = #tpu.core_type<tc>} {
    %c0 = arith.constant 0 : index
    %c0_0 = arith.constant 0 : index
    %0 = vector.load %arg0[%c0, %c0_0] : memref<64x8xbf16, #tpu.memory_space<vmem>>, vector<64x8xbf16>
    %c0_1 = arith.constant 0 : index
    %c0_2 = arith.constant 0 : index
    %1 = vector.load %arg2[%c0_1, %c0_2] : memref<8x384xbf16, #tpu.memory_space<vmem>>, vector<8x384xbf16>
    %cst = arith.constant dense<0.000000e+00> : vector<64x384xf32>
    %2 = tpu.matmul %0, %1, %cst {dimension_numbers = #tpu.dot_dimension_numbers<[1], [0], [0], [1], [0, 0, 1, 1], [], []>} : vector<64x8xbf16>, vector<8x384xbf16>, vector<64x384xf32> -> vector<64x384xf32>
    %c0_3 = arith.constant 0 : index
    %c0_4 = arith.constant 0 : index
    %3 = vector.load %arg4[%c0_3, %c0_4] : memref<1x384xf32, #tpu.memory_space<vmem>>, vector<1x384xf32>
    %4 = vector.broadcast %3 : vector<1x384xf32> to vector<64x384xf32>
    %5 = arith.addf %2, %4 : vector<64x384xf32>
    %c0_5 = arith.constant 0 : index
    %c0_6 = arith.constant 0 : index
    %6 = vector.load %arg3[%c0_5, %c0_6] : memref<128x384xbf16, #tpu.memory_space<vmem>>, vector<128x384xbf16>
    %c0_7 = arith.constant 0 : index
    %c0_8 = arith.constant 0 : index
    %7 = vector.load %arg5[%c0_7, %c0_8] : memref<1x128xf32, #tpu.memory_space<vmem>>, vector<1x128xf32>
    %c0_9 = arith.constant 0 : index
    %c0_10 = arith.constant 0 : index
    %8 = vector.load %arg1[%c0_9, %c0_10] : memref<64x1xf32, #tpu.memory_space<vmem>>, vector<64x1xf32>
    %9 = vector.shape_cast %8 : vector<64x1xf32> to vector<64x1xf32>
    %10 = vector.broadcast %9 : vector<64x1xf32> to vector<64x128xf32>
    %cst_11 = arith.constant 0.000000e+00 : f32
    %11 = vector.broadcast %cst_11 : f32 to vector<8x128xf32>
    %12 = vector.extract_strided_slice %5 {offsets = [0, 0], sizes = [8, 384], strides = [1, 1]} : vector<64x384xf32> to vector<8x384xf32>
    %13 = arith.truncf %11 : vector<8x128xf32> to vector<8x128xbf16>
    %cst_12 = arith.constant dense<0.000000e+00> : vector<8x384xf32>
    %14 = tpu.matmul %13, %6, %cst_12 {dimension_numbers = #tpu.dot_dimension_numbers<[1], [0], [0], [1], [0, 0, 1, 1], [], []>} : vector<8x128xbf16>, vector<128x384xbf16>, vector<8x384xf32> -> vector<8x384xf32>
    %15 = vector.extract_strided_slice %12 {offsets = [0, 0], sizes = [8, 128], strides = [1, 1]} : vector<8x384xf32> to vector<8x128xf32>
    %16 = vector.extract_strided_slice %14 {offsets = [0, 0], sizes = [8, 128], strides = [1, 1]} : vector<8x384xf32> to vector<8x128xf32>
    %17 = arith.addf %15, %16 : vector<8x128xf32>
    %18 = arith.negf %17 : vector<8x128xf32>
    %19 = math.exp %18 : vector<8x128xf32>
    %cst_13 = arith.constant 1.000000e+00 : f32
    %20 = vector.broadcast %cst_13 : f32 to vector<8x128xf32>
    %21 = arith.addf %20, %19 : vector<8x128xf32>
    %22 = arith.divf %20, %21 : vector<8x128xf32>
    %23 = vector.extract_strided_slice %12 {offsets = [0, 128], sizes = [8, 128], strides = [1, 1]} : vector<8x384xf32> to vector<8x128xf32>
    %24 = vector.extract_strided_slice %14 {offsets = [0, 128], sizes = [8, 128], strides = [1, 1]} : vector<8x384xf32> to vector<8x128xf32>
    %25 = arith.addf %23, %24 : vector<8x128xf32>
    %26 = arith.negf %25 : vector<8x128xf32>
    %27 = math.exp %26 : vector<8x128xf32>
    %cst_14 = arith.constant 1.000000e+00 : f32
    %28 = vector.broadcast %cst_14 : f32 to vector<8x128xf32>
    %29 = arith.addf %28, %27 : vector<8x128xf32>
    %30 = arith.divf %28, %29 : vector<8x128xf32>
    %31 = vector.extract_strided_slice %12 {offsets = [0, 256], sizes = [8, 128], strides = [1, 1]} : vector<8x384xf32> to vector<8x128xf32>
    %32 = vector.extract_strided_slice %14 {offsets = [0, 256], sizes = [8, 128], strides = [1, 1]} : vector<8x384xf32> to vector<8x128xf32>
    %33 = vector.broadcast %7 : vector<1x128xf32> to vector<8x128xf32>
    %34 = arith.addf %32, %33 : vector<8x128xf32>
    %35 = arith.mulf %22, %34 : vector<8x128xf32>
    %36 = arith.addf %31, %35 : vector<8x128xf32>
    %37 = math.tanh %36 : vector<8x128xf32>
    %cst_15 = arith.constant 1.000000e+00 : f32
    %38 = vector.broadcast %cst_15 : f32 to vector<8x128xf32>
    %39 = arith.subf %38, %30 : vector<8x128xf32>
    %40 = arith.mulf %39, %37 : vector<8x128xf32>
    %41 = arith.mulf %30, %11 : vector<8x128xf32>
    %42 = arith.addf %40, %41 : vector<8x128xf32>
    %43 = vector.extract_strided_slice %10 {offsets = [0, 0], sizes = [8, 128], strides = [1, 1]} : vector<64x128xf32> to vector<8x128xf32>
    %44 = arith.subf %42, %11 : vector<8x128xf32>
    %45 = arith.mulf %43, %44 : vector<8x128xf32>
    %46 = arith.addf %11, %45 : vector<8x128xf32>
    %47 = vector.extract_strided_slice %5 {offsets = [8, 0], sizes = [8, 384], strides = [1, 1]} : vector<64x384xf32> to vector<8x384xf32>
    %48 = arith.truncf %46 : vector<8x128xf32> to vector<8x128xbf16>
    %cst_16 = arith.constant dense<0.000000e+00> : vector<8x384xf32>
    %49 = tpu.matmul %48, %6, %cst_16 {dimension_numbers = #tpu.dot_dimension_numbers<[1], [0], [0], [1], [0, 0, 1, 1], [], []>} : vector<8x128xbf16>, vector<128x384xbf16>, vector<8x384xf32> -> vector<8x384xf32>
    %50 = vector.extract_strided_slice %47 {offsets = [0, 0], sizes = [8, 128], strides = [1, 1]} : vector<8x384xf32> to vector<8x128xf32>
    %51 = vector.extract_strided_slice %49 {offsets = [0, 0], sizes = [8, 128], strides = [1, 1]} : vector<8x384xf32> to vector<8x128xf32>
    %52 = arith.addf %50, %51 : vector<8x128xf32>
    %53 = arith.negf %52 : vector<8x128xf32>
    %54 = math.exp %53 : vector<8x128xf32>
    %cst_17 = arith.constant 1.000000e+00 : f32
    %55 = vector.broadcast %cst_17 : f32 to vector<8x128xf32>
    %56 = arith.addf %55, %54 : vector<8x128xf32>
    %57 = arith.divf %55, %56 : vector<8x128xf32>
    %58 = vector.extract_strided_slice %47 {offsets = [0, 128], sizes = [8, 128], strides = [1, 1]} : vector<8x384xf32> to vector<8x128xf32>
    %59 = vector.extract_strided_slice %49 {offsets = [0, 128], sizes = [8, 128], strides = [1, 1]} : vector<8x384xf32> to vector<8x128xf32>
    %60 = arith.addf %58, %59 : vector<8x128xf32>
    %61 = arith.negf %60 : vector<8x128xf32>
    %62 = math.exp %61 : vector<8x128xf32>
    %cst_18 = arith.constant 1.000000e+00 : f32
    %63 = vector.broadcast %cst_18 : f32 to vector<8x128xf32>
    %64 = arith.addf %63, %62 : vector<8x128xf32>
    %65 = arith.divf %63, %64 : vector<8x128xf32>
    %66 = vector.extract_strided_slice %47 {offsets = [0, 256], sizes = [8, 128], strides = [1, 1]} : vector<8x384xf32> to vector<8x128xf32>
    %67 = vector.extract_strided_slice %49 {offsets = [0, 256], sizes = [8, 128], strides = [1, 1]} : vector<8x384xf32> to vector<8x128xf32>
    %68 = vector.broadcast %7 : vector<1x128xf32> to vector<8x128xf32>
    %69 = arith.addf %67, %68 : vector<8x128xf32>
    %70 = arith.mulf %57, %69 : vector<8x128xf32>
    %71 = arith.addf %66, %70 : vector<8x128xf32>
    %72 = math.tanh %71 : vector<8x128xf32>
    %cst_19 = arith.constant 1.000000e+00 : f32
    %73 = vector.broadcast %cst_19 : f32 to vector<8x128xf32>
    %74 = arith.subf %73, %65 : vector<8x128xf32>
    %75 = arith.mulf %74, %72 : vector<8x128xf32>
    %76 = arith.mulf %65, %46 : vector<8x128xf32>
    %77 = arith.addf %75, %76 : vector<8x128xf32>
    %78 = vector.extract_strided_slice %10 {offsets = [8, 0], sizes = [8, 128], strides = [1, 1]} : vector<64x128xf32> to vector<8x128xf32>
    %79 = arith.subf %77, %46 : vector<8x128xf32>
    %80 = arith.mulf %78, %79 : vector<8x128xf32>
    %81 = arith.addf %46, %80 : vector<8x128xf32>
    %82 = vector.extract_strided_slice %5 {offsets = [16, 0], sizes = [8, 384], strides = [1, 1]} : vector<64x384xf32> to vector<8x384xf32>
    %83 = arith.truncf %81 : vector<8x128xf32> to vector<8x128xbf16>
    %cst_20 = arith.constant dense<0.000000e+00> : vector<8x384xf32>
    %84 = tpu.matmul %83, %6, %cst_20 {dimension_numbers = #tpu.dot_dimension_numbers<[1], [0], [0], [1], [0, 0, 1, 1], [], []>} : vector<8x128xbf16>, vector<128x384xbf16>, vector<8x384xf32> -> vector<8x384xf32>
    %85 = vector.extract_strided_slice %82 {offsets = [0, 0], sizes = [8, 128], strides = [1, 1]} : vector<8x384xf32> to vector<8x128xf32>
    %86 = vector.extract_strided_slice %84 {offsets = [0, 0], sizes = [8, 128], strides = [1, 1]} : vector<8x384xf32> to vector<8x128xf32>
    %87 = arith.addf %85, %86 : vector<8x128xf32>
    %88 = arith.negf %87 : vector<8x128xf32>
    %89 = math.exp %88 : vector<8x128xf32>
    %cst_21 = arith.constant 1.000000e+00 : f32
    %90 = vector.broadcast %cst_21 : f32 to vector<8x128xf32>
    %91 = arith.addf %90, %89 : vector<8x128xf32>
    %92 = arith.divf %90, %91 : vector<8x128xf32>
    %93 = vector.extract_strided_slice %82 {offsets = [0, 128], sizes = [8, 128], strides = [1, 1]} : vector<8x384xf32> to vector<8x128xf32>
    %94 = vector.extract_strided_slice %84 {offsets = [0, 128], sizes = [8, 128], strides = [1, 1]} : vector<8x384xf32> to vector<8x128xf32>
    %95 = arith.addf %93, %94 : vector<8x128xf32>
    %96 = arith.negf %95 : vector<8x128xf32>
    %97 = math.exp %96 : vector<8x128xf32>
    %cst_22 = arith.constant 1.000000e+00 : f32
    %98 = vector.broadcast %cst_22 : f32 to vector<8x128xf32>
    %99 = arith.addf %98, %97 : vector<8x128xf32>
    %100 = arith.divf %98, %99 : vector<8x128xf32>
    %101 = vector.extract_strided_slice %82 {offsets = [0, 256], sizes = [8, 128], strides = [1, 1]} : vector<8x384xf32> to vector<8x128xf32>
    %102 = vector.extract_strided_slice %84 {offsets = [0, 256], sizes = [8, 128], strides = [1, 1]} : vector<8x384xf32> to vector<8x128xf32>
    %103 = vector.broadcast %7 : vector<1x128xf32> to vector<8x128xf32>
    %104 = arith.addf %102, %103 : vector<8x128xf32>
    %105 = arith.mulf %92, %104 : vector<8x128xf32>
    %106 = arith.addf %101, %105 : vector<8x128xf32>
    %107 = math.tanh %106 : vector<8x128xf32>
    %cst_23 = arith.constant 1.000000e+00 : f32
    %108 = vector.broadcast %cst_23 : f32 to vector<8x128xf32>
    %109 = arith.subf %108, %100 : vector<8x128xf32>
    %110 = arith.mulf %109, %107 : vector<8x128xf32>
    %111 = arith.mulf %100, %81 : vector<8x128xf32>
    %112 = arith.addf %110, %111 : vector<8x128xf32>
    %113 = vector.extract_strided_slice %10 {offsets = [16, 0], sizes = [8, 128], strides = [1, 1]} : vector<64x128xf32> to vector<8x128xf32>
    %114 = arith.subf %112, %81 : vector<8x128xf32>
    %115 = arith.mulf %113, %114 : vector<8x128xf32>
    %116 = arith.addf %81, %115 : vector<8x128xf32>
    %117 = vector.extract_strided_slice %5 {offsets = [24, 0], sizes = [8, 384], strides = [1, 1]} : vector<64x384xf32> to vector<8x384xf32>
    %118 = arith.truncf %116 : vector<8x128xf32> to vector<8x128xbf16>
    %cst_24 = arith.constant dense<0.000000e+00> : vector<8x384xf32>
    %119 = tpu.matmul %118, %6, %cst_24 {dimension_numbers = #tpu.dot_dimension_numbers<[1], [0], [0], [1], [0, 0, 1, 1], [], []>} : vector<8x128xbf16>, vector<128x384xbf16>, vector<8x384xf32> -> vector<8x384xf32>
    %120 = vector.extract_strided_slice %117 {offsets = [0, 0], sizes = [8, 128], strides = [1, 1]} : vector<8x384xf32> to vector<8x128xf32>
    %121 = vector.extract_strided_slice %119 {offsets = [0, 0], sizes = [8, 128], strides = [1, 1]} : vector<8x384xf32> to vector<8x128xf32>
    %122 = arith.addf %120, %121 : vector<8x128xf32>
    %123 = arith.negf %122 : vector<8x128xf32>
    %124 = math.exp %123 : vector<8x128xf32>
    %cst_25 = arith.constant 1.000000e+00 : f32
    %125 = vector.broadcast %cst_25 : f32 to vector<8x128xf32>
    %126 = arith.addf %125, %124 : vector<8x128xf32>
    %127 = arith.divf %125, %126 : vector<8x128xf32>
    %128 = vector.extract_strided_slice %117 {offsets = [0, 128], sizes = [8, 128], strides = [1, 1]} : vector<8x384xf32> to vector<8x128xf32>
    %129 = vector.extract_strided_slice %119 {offsets = [0, 128], sizes = [8, 128], strides = [1, 1]} : vector<8x384xf32> to vector<8x128xf32>
    %130 = arith.addf %128, %129 : vector<8x128xf32>
    %131 = arith.negf %130 : vector<8x128xf32>
    %132 = math.exp %131 : vector<8x128xf32>
    %cst_26 = arith.constant 1.000000e+00 : f32
    %133 = vector.broadcast %cst_26 : f32 to vector<8x128xf32>
    %134 = arith.addf %133, %132 : vector<8x128xf32>
    %135 = arith.divf %133, %134 : vector<8x128xf32>
    %136 = vector.extract_strided_slice %117 {offsets = [0, 256], sizes = [8, 128], strides = [1, 1]} : vector<8x384xf32> to vector<8x128xf32>
    %137 = vector.extract_strided_slice %119 {offsets = [0, 256], sizes = [8, 128], strides = [1, 1]} : vector<8x384xf32> to vector<8x128xf32>
    %138 = vector.broadcast %7 : vector<1x128xf32> to vector<8x128xf32>
    %139 = arith.addf %137, %138 : vector<8x128xf32>
    %140 = arith.mulf %127, %139 : vector<8x128xf32>
    %141 = arith.addf %136, %140 : vector<8x128xf32>
    %142 = math.tanh %141 : vector<8x128xf32>
    %cst_27 = arith.constant 1.000000e+00 : f32
    %143 = vector.broadcast %cst_27 : f32 to vector<8x128xf32>
    %144 = arith.subf %143, %135 : vector<8x128xf32>
    %145 = arith.mulf %144, %142 : vector<8x128xf32>
    %146 = arith.mulf %135, %116 : vector<8x128xf32>
    %147 = arith.addf %145, %146 : vector<8x128xf32>
    %148 = vector.extract_strided_slice %10 {offsets = [24, 0], sizes = [8, 128], strides = [1, 1]} : vector<64x128xf32> to vector<8x128xf32>
    %149 = arith.subf %147, %116 : vector<8x128xf32>
    %150 = arith.mulf %148, %149 : vector<8x128xf32>
    %151 = arith.addf %116, %150 : vector<8x128xf32>
    %152 = vector.extract_strided_slice %5 {offsets = [32, 0], sizes = [8, 384], strides = [1, 1]} : vector<64x384xf32> to vector<8x384xf32>
    %153 = arith.truncf %151 : vector<8x128xf32> to vector<8x128xbf16>
    %cst_28 = arith.constant dense<0.000000e+00> : vector<8x384xf32>
    %154 = tpu.matmul %153, %6, %cst_28 {dimension_numbers = #tpu.dot_dimension_numbers<[1], [0], [0], [1], [0, 0, 1, 1], [], []>} : vector<8x128xbf16>, vector<128x384xbf16>, vector<8x384xf32> -> vector<8x384xf32>
    %155 = vector.extract_strided_slice %152 {offsets = [0, 0], sizes = [8, 128], strides = [1, 1]} : vector<8x384xf32> to vector<8x128xf32>
    %156 = vector.extract_strided_slice %154 {offsets = [0, 0], sizes = [8, 128], strides = [1, 1]} : vector<8x384xf32> to vector<8x128xf32>
    %157 = arith.addf %155, %156 : vector<8x128xf32>
    %158 = arith.negf %157 : vector<8x128xf32>
    %159 = math.exp %158 : vector<8x128xf32>
    %cst_29 = arith.constant 1.000000e+00 : f32
    %160 = vector.broadcast %cst_29 : f32 to vector<8x128xf32>
    %161 = arith.addf %160, %159 : vector<8x128xf32>
    %162 = arith.divf %160, %161 : vector<8x128xf32>
    %163 = vector.extract_strided_slice %152 {offsets = [0, 128], sizes = [8, 128], strides = [1, 1]} : vector<8x384xf32> to vector<8x128xf32>
    %164 = vector.extract_strided_slice %154 {offsets = [0, 128], sizes = [8, 128], strides = [1, 1]} : vector<8x384xf32> to vector<8x128xf32>
    %165 = arith.addf %163, %164 : vector<8x128xf32>
    %166 = arith.negf %165 : vector<8x128xf32>
    %167 = math.exp %166 : vector<8x128xf32>
    %cst_30 = arith.constant 1.000000e+00 : f32
    %168 = vector.broadcast %cst_30 : f32 to vector<8x128xf32>
    %169 = arith.addf %168, %167 : vector<8x128xf32>
    %170 = arith.divf %168, %169 : vector<8x128xf32>
    %171 = vector.extract_strided_slice %152 {offsets = [0, 256], sizes = [8, 128], strides = [1, 1]} : vector<8x384xf32> to vector<8x128xf32>
    %172 = vector.extract_strided_slice %154 {offsets = [0, 256], sizes = [8, 128], strides = [1, 1]} : vector<8x384xf32> to vector<8x128xf32>
    %173 = vector.broadcast %7 : vector<1x128xf32> to vector<8x128xf32>
    %174 = arith.addf %172, %173 : vector<8x128xf32>
    %175 = arith.mulf %162, %174 : vector<8x128xf32>
    %176 = arith.addf %171, %175 : vector<8x128xf32>
    %177 = math.tanh %176 : vector<8x128xf32>
    %cst_31 = arith.constant 1.000000e+00 : f32
    %178 = vector.broadcast %cst_31 : f32 to vector<8x128xf32>
    %179 = arith.subf %178, %170 : vector<8x128xf32>
    %180 = arith.mulf %179, %177 : vector<8x128xf32>
    %181 = arith.mulf %170, %151 : vector<8x128xf32>
    %182 = arith.addf %180, %181 : vector<8x128xf32>
    %183 = vector.extract_strided_slice %10 {offsets = [32, 0], sizes = [8, 128], strides = [1, 1]} : vector<64x128xf32> to vector<8x128xf32>
    %184 = arith.subf %182, %151 : vector<8x128xf32>
    %185 = arith.mulf %183, %184 : vector<8x128xf32>
    %186 = arith.addf %151, %185 : vector<8x128xf32>
    %187 = vector.extract_strided_slice %5 {offsets = [40, 0], sizes = [8, 384], strides = [1, 1]} : vector<64x384xf32> to vector<8x384xf32>
    %188 = arith.truncf %186 : vector<8x128xf32> to vector<8x128xbf16>
    %cst_32 = arith.constant dense<0.000000e+00> : vector<8x384xf32>
    %189 = tpu.matmul %188, %6, %cst_32 {dimension_numbers = #tpu.dot_dimension_numbers<[1], [0], [0], [1], [0, 0, 1, 1], [], []>} : vector<8x128xbf16>, vector<128x384xbf16>, vector<8x384xf32> -> vector<8x384xf32>
    %190 = vector.extract_strided_slice %187 {offsets = [0, 0], sizes = [8, 128], strides = [1, 1]} : vector<8x384xf32> to vector<8x128xf32>
    %191 = vector.extract_strided_slice %189 {offsets = [0, 0], sizes = [8, 128], strides = [1, 1]} : vector<8x384xf32> to vector<8x128xf32>
    %192 = arith.addf %190, %191 : vector<8x128xf32>
    %193 = arith.negf %192 : vector<8x128xf32>
    %194 = math.exp %193 : vector<8x128xf32>
    %cst_33 = arith.constant 1.000000e+00 : f32
    %195 = vector.broadcast %cst_33 : f32 to vector<8x128xf32>
    %196 = arith.addf %195, %194 : vector<8x128xf32>
    %197 = arith.divf %195, %196 : vector<8x128xf32>
    %198 = vector.extract_strided_slice %187 {offsets = [0, 128], sizes = [8, 128], strides = [1, 1]} : vector<8x384xf32> to vector<8x128xf32>
    %199 = vector.extract_strided_slice %189 {offsets = [0, 128], sizes = [8, 128], strides = [1, 1]} : vector<8x384xf32> to vector<8x128xf32>
    %200 = arith.addf %198, %199 : vector<8x128xf32>
    %201 = arith.negf %200 : vector<8x128xf32>
    %202 = math.exp %201 : vector<8x128xf32>
    %cst_34 = arith.constant 1.000000e+00 : f32
    %203 = vector.broadcast %cst_34 : f32 to vector<8x128xf32>
    %204 = arith.addf %203, %202 : vector<8x128xf32>
    %205 = arith.divf %203, %204 : vector<8x128xf32>
    %206 = vector.extract_strided_slice %187 {offsets = [0, 256], sizes = [8, 128], strides = [1, 1]} : vector<8x384xf32> to vector<8x128xf32>
    %207 = vector.extract_strided_slice %189 {offsets = [0, 256], sizes = [8, 128], strides = [1, 1]} : vector<8x384xf32> to vector<8x128xf32>
    %208 = vector.broadcast %7 : vector<1x128xf32> to vector<8x128xf32>
    %209 = arith.addf %207, %208 : vector<8x128xf32>
    %210 = arith.mulf %197, %209 : vector<8x128xf32>
    %211 = arith.addf %206, %210 : vector<8x128xf32>
    %212 = math.tanh %211 : vector<8x128xf32>
    %cst_35 = arith.constant 1.000000e+00 : f32
    %213 = vector.broadcast %cst_35 : f32 to vector<8x128xf32>
    %214 = arith.subf %213, %205 : vector<8x128xf32>
    %215 = arith.mulf %214, %212 : vector<8x128xf32>
    %216 = arith.mulf %205, %186 : vector<8x128xf32>
    %217 = arith.addf %215, %216 : vector<8x128xf32>
    %218 = vector.extract_strided_slice %10 {offsets = [40, 0], sizes = [8, 128], strides = [1, 1]} : vector<64x128xf32> to vector<8x128xf32>
    %219 = arith.subf %217, %186 : vector<8x128xf32>
    %220 = arith.mulf %218, %219 : vector<8x128xf32>
    %221 = arith.addf %186, %220 : vector<8x128xf32>
    %222 = vector.extract_strided_slice %5 {offsets = [48, 0], sizes = [8, 384], strides = [1, 1]} : vector<64x384xf32> to vector<8x384xf32>
    %223 = arith.truncf %221 : vector<8x128xf32> to vector<8x128xbf16>
    %cst_36 = arith.constant dense<0.000000e+00> : vector<8x384xf32>
    %224 = tpu.matmul %223, %6, %cst_36 {dimension_numbers = #tpu.dot_dimension_numbers<[1], [0], [0], [1], [0, 0, 1, 1], [], []>} : vector<8x128xbf16>, vector<128x384xbf16>, vector<8x384xf32> -> vector<8x384xf32>
    %225 = vector.extract_strided_slice %222 {offsets = [0, 0], sizes = [8, 128], strides = [1, 1]} : vector<8x384xf32> to vector<8x128xf32>
    %226 = vector.extract_strided_slice %224 {offsets = [0, 0], sizes = [8, 128], strides = [1, 1]} : vector<8x384xf32> to vector<8x128xf32>
    %227 = arith.addf %225, %226 : vector<8x128xf32>
    %228 = arith.negf %227 : vector<8x128xf32>
    %229 = math.exp %228 : vector<8x128xf32>
    %cst_37 = arith.constant 1.000000e+00 : f32
    %230 = vector.broadcast %cst_37 : f32 to vector<8x128xf32>
    %231 = arith.addf %230, %229 : vector<8x128xf32>
    %232 = arith.divf %230, %231 : vector<8x128xf32>
    %233 = vector.extract_strided_slice %222 {offsets = [0, 128], sizes = [8, 128], strides = [1, 1]} : vector<8x384xf32> to vector<8x128xf32>
    %234 = vector.extract_strided_slice %224 {offsets = [0, 128], sizes = [8, 128], strides = [1, 1]} : vector<8x384xf32> to vector<8x128xf32>
    %235 = arith.addf %233, %234 : vector<8x128xf32>
    %236 = arith.negf %235 : vector<8x128xf32>
    %237 = math.exp %236 : vector<8x128xf32>
    %cst_38 = arith.constant 1.000000e+00 : f32
    %238 = vector.broadcast %cst_38 : f32 to vector<8x128xf32>
    %239 = arith.addf %238, %237 : vector<8x128xf32>
    %240 = arith.divf %238, %239 : vector<8x128xf32>
    %241 = vector.extract_strided_slice %222 {offsets = [0, 256], sizes = [8, 128], strides = [1, 1]} : vector<8x384xf32> to vector<8x128xf32>
    %242 = vector.extract_strided_slice %224 {offsets = [0, 256], sizes = [8, 128], strides = [1, 1]} : vector<8x384xf32> to vector<8x128xf32>
    %243 = vector.broadcast %7 : vector<1x128xf32> to vector<8x128xf32>
    %244 = arith.addf %242, %243 : vector<8x128xf32>
    %245 = arith.mulf %232, %244 : vector<8x128xf32>
    %246 = arith.addf %241, %245 : vector<8x128xf32>
    %247 = math.tanh %246 : vector<8x128xf32>
    %cst_39 = arith.constant 1.000000e+00 : f32
    %248 = vector.broadcast %cst_39 : f32 to vector<8x128xf32>
    %249 = arith.subf %248, %240 : vector<8x128xf32>
    %250 = arith.mulf %249, %247 : vector<8x128xf32>
    %251 = arith.mulf %240, %221 : vector<8x128xf32>
    %252 = arith.addf %250, %251 : vector<8x128xf32>
    %253 = vector.extract_strided_slice %10 {offsets = [48, 0], sizes = [8, 128], strides = [1, 1]} : vector<64x128xf32> to vector<8x128xf32>
    %254 = arith.subf %252, %221 : vector<8x128xf32>
    %255 = arith.mulf %253, %254 : vector<8x128xf32>
    %256 = arith.addf %221, %255 : vector<8x128xf32>
    %257 = vector.extract_strided_slice %5 {offsets = [56, 0], sizes = [8, 384], strides = [1, 1]} : vector<64x384xf32> to vector<8x384xf32>
    %258 = arith.truncf %256 : vector<8x128xf32> to vector<8x128xbf16>
    %cst_40 = arith.constant dense<0.000000e+00> : vector<8x384xf32>
    %259 = tpu.matmul %258, %6, %cst_40 {dimension_numbers = #tpu.dot_dimension_numbers<[1], [0], [0], [1], [0, 0, 1, 1], [], []>} : vector<8x128xbf16>, vector<128x384xbf16>, vector<8x384xf32> -> vector<8x384xf32>
    %260 = vector.extract_strided_slice %257 {offsets = [0, 0], sizes = [8, 128], strides = [1, 1]} : vector<8x384xf32> to vector<8x128xf32>
    %261 = vector.extract_strided_slice %259 {offsets = [0, 0], sizes = [8, 128], strides = [1, 1]} : vector<8x384xf32> to vector<8x128xf32>
    %262 = arith.addf %260, %261 : vector<8x128xf32>
    %263 = arith.negf %262 : vector<8x128xf32>
    %264 = math.exp %263 : vector<8x128xf32>
    %cst_41 = arith.constant 1.000000e+00 : f32
    %265 = vector.broadcast %cst_41 : f32 to vector<8x128xf32>
    %266 = arith.addf %265, %264 : vector<8x128xf32>
    %267 = arith.divf %265, %266 : vector<8x128xf32>
    %268 = vector.extract_strided_slice %257 {offsets = [0, 128], sizes = [8, 128], strides = [1, 1]} : vector<8x384xf32> to vector<8x128xf32>
    %269 = vector.extract_strided_slice %259 {offsets = [0, 128], sizes = [8, 128], strides = [1, 1]} : vector<8x384xf32> to vector<8x128xf32>
    %270 = arith.addf %268, %269 : vector<8x128xf32>
    %271 = arith.negf %270 : vector<8x128xf32>
    %272 = math.exp %271 : vector<8x128xf32>
    %cst_42 = arith.constant 1.000000e+00 : f32
    %273 = vector.broadcast %cst_42 : f32 to vector<8x128xf32>
    %274 = arith.addf %273, %272 : vector<8x128xf32>
    %275 = arith.divf %273, %274 : vector<8x128xf32>
    %276 = vector.extract_strided_slice %257 {offsets = [0, 256], sizes = [8, 128], strides = [1, 1]} : vector<8x384xf32> to vector<8x128xf32>
    %277 = vector.extract_strided_slice %259 {offsets = [0, 256], sizes = [8, 128], strides = [1, 1]} : vector<8x384xf32> to vector<8x128xf32>
    %278 = vector.broadcast %7 : vector<1x128xf32> to vector<8x128xf32>
    %279 = arith.addf %277, %278 : vector<8x128xf32>
    %280 = arith.mulf %267, %279 : vector<8x128xf32>
    %281 = arith.addf %276, %280 : vector<8x128xf32>
    %282 = math.tanh %281 : vector<8x128xf32>
    %cst_43 = arith.constant 1.000000e+00 : f32
    %283 = vector.broadcast %cst_43 : f32 to vector<8x128xf32>
    %284 = arith.subf %283, %275 : vector<8x128xf32>
    %285 = arith.mulf %284, %282 : vector<8x128xf32>
    %286 = arith.mulf %275, %256 : vector<8x128xf32>
    %287 = arith.addf %285, %286 : vector<8x128xf32>
    %288 = vector.extract_strided_slice %10 {offsets = [56, 0], sizes = [8, 128], strides = [1, 1]} : vector<64x128xf32> to vector<8x128xf32>
    %289 = arith.subf %287, %256 : vector<8x128xf32>
    %290 = arith.mulf %288, %289 : vector<8x128xf32>
    %291 = arith.addf %256, %290 : vector<8x128xf32>
    %292 = arith.truncf %291 : vector<8x128xf32> to vector<8x128xbf16>
    %c0_44 = arith.constant 0 : index
    %c0_45 = arith.constant 0 : index
    %293 = vector.load %arg6[%c0_44, %c0_45] : memref<128x128xbf16, #tpu.memory_space<vmem>>, vector<128x128xbf16>
    %cst_46 = arith.constant dense<0.000000e+00> : vector<8x128xf32>
    %294 = tpu.matmul %292, %293, %cst_46 {dimension_numbers = #tpu.dot_dimension_numbers<[1], [0], [0], [1], [0, 0, 1, 1], [], []>} : vector<8x128xbf16>, vector<128x128xbf16>, vector<8x128xf32> -> vector<8x128xf32>
    %c0_47 = arith.constant 0 : index
    %c0_48 = arith.constant 0 : index
    %295 = vector.load %arg7[%c0_47, %c0_48] : memref<1x128xf32, #tpu.memory_space<vmem>>, vector<1x128xf32>
    %296 = vector.broadcast %295 : vector<1x128xf32> to vector<8x128xf32>
    %297 = arith.addf %294, %296 : vector<8x128xf32>
    %cst_49 = arith.constant 0.000000e+00 : f32
    %298 = vector.broadcast %cst_49 : f32 to vector<8x128xf32>
    %299 = arith.maximumf %297, %298 : vector<8x128xf32>
    %300 = arith.truncf %299 : vector<8x128xf32> to vector<8x128xbf16>
    %c0_50 = arith.constant 0 : index
    %c0_51 = arith.constant 0 : index
    %301 = vector.load %arg8[%c0_50, %c0_51] : memref<128x128xbf16, #tpu.memory_space<vmem>>, vector<128x128xbf16>
    %cst_52 = arith.constant dense<0.000000e+00> : vector<8x128xf32>
    %302 = tpu.matmul %300, %301, %cst_52 {dimension_numbers = #tpu.dot_dimension_numbers<[1], [0], [0], [1], [0, 0, 1, 1], [], []>} : vector<8x128xbf16>, vector<128x128xbf16>, vector<8x128xf32> -> vector<8x128xf32>
    %c0_53 = arith.constant 0 : index
    %c0_54 = arith.constant 0 : index
    %303 = vector.load %arg9[%c0_53, %c0_54] : memref<1x128xf32, #tpu.memory_space<vmem>>, vector<1x128xf32>
    %304 = vector.broadcast %303 : vector<1x128xf32> to vector<8x128xf32>
    %305 = arith.addf %302, %304 : vector<8x128xf32>
    %c0_55 = arith.constant 0 : index
    %c0_56 = arith.constant 0 : index
    %306 = vector.load %arg10[%c0_55, %c0_56] : memref<8x4xf32, #tpu.memory_space<vmem>>, vector<8x4xf32>
    %cst_57 = arith.constant 1.000000e+00 : f32
    %307 = vector.broadcast %cst_57 : f32 to vector<8x4xf32>
    %308 = arith.subf %307, %306 : vector<8x4xf32>
    %309 = vector.extract_strided_slice %305 {offsets = [0, 0], sizes = [8, 8], strides = [1, 1]} : vector<8x128xf32> to vector<8x8xf32>
    %cst_58 = arith.constant dense<0xFF800000> : vector<8xf32>
    %310 = vector.multi_reduction <maximumf>, %309, %cst_58 [1] : vector<8x8xf32> to vector<8xf32>
    %311 = vector.shape_cast %310 : vector<8xf32> to vector<8x1xf32>
    %312 = vector.broadcast %311 : vector<8x1xf32> to vector<8x8xf32>
    %313 = arith.subf %309, %312 : vector<8x8xf32>
    %314 = math.exp %313 : vector<8x8xf32>
    %cst_59 = arith.constant dense<0.000000e+00> : vector<8xf32>
    %315 = vector.multi_reduction <add>, %314, %cst_59 [1] : vector<8x8xf32> to vector<8xf32>
    %316 = vector.shape_cast %315 : vector<8xf32> to vector<8x1xf32>
    %317 = tpu.reciprocal %316 {approx = true} : vector<8x1xf32> -> vector<8x1xf32>
    %318 = vector.broadcast %317 : vector<8x1xf32> to vector<8x8xf32>
    %319 = arith.mulf %314, %318 : vector<8x8xf32>
    %320 = vector.extract_strided_slice %308 {offsets = [0, 0], sizes = [8, 1], strides = [1, 1]} : vector<8x4xf32> to vector<8x1xf32>
    %321 = vector.broadcast %320 : vector<8x1xf32> to vector<8x8xf32>
    %322 = arith.mulf %319, %321 : vector<8x8xf32>
    %323 = vector.extract_strided_slice %305 {offsets = [0, 8], sizes = [8, 8], strides = [1, 1]} : vector<8x128xf32> to vector<8x8xf32>
    %cst_60 = arith.constant dense<0xFF800000> : vector<8xf32>
    %324 = vector.multi_reduction <maximumf>, %323, %cst_60 [1] : vector<8x8xf32> to vector<8xf32>
    %325 = vector.shape_cast %324 : vector<8xf32> to vector<8x1xf32>
    %326 = vector.broadcast %325 : vector<8x1xf32> to vector<8x8xf32>
    %327 = arith.subf %323, %326 : vector<8x8xf32>
    %328 = math.exp %327 : vector<8x8xf32>
    %cst_61 = arith.constant dense<0.000000e+00> : vector<8xf32>
    %329 = vector.multi_reduction <add>, %328, %cst_61 [1] : vector<8x8xf32> to vector<8xf32>
    %330 = vector.shape_cast %329 : vector<8xf32> to vector<8x1xf32>
    %331 = tpu.reciprocal %330 {approx = true} : vector<8x1xf32> -> vector<8x1xf32>
    %332 = vector.broadcast %331 : vector<8x1xf32> to vector<8x8xf32>
    %333 = arith.mulf %328, %332 : vector<8x8xf32>
    %334 = vector.extract_strided_slice %308 {offsets = [0, 1], sizes = [8, 1], strides = [1, 1]} : vector<8x4xf32> to vector<8x1xf32>
    %335 = vector.broadcast %334 : vector<8x1xf32> to vector<8x8xf32>
    %336 = arith.mulf %333, %335 : vector<8x8xf32>
    %337 = vector.extract_strided_slice %305 {offsets = [0, 16], sizes = [8, 8], strides = [1, 1]} : vector<8x128xf32> to vector<8x8xf32>
    %cst_62 = arith.constant dense<0xFF800000> : vector<8xf32>
    %338 = vector.multi_reduction <maximumf>, %337, %cst_62 [1] : vector<8x8xf32> to vector<8xf32>
    %339 = vector.shape_cast %338 : vector<8xf32> to vector<8x1xf32>
    %340 = vector.broadcast %339 : vector<8x1xf32> to vector<8x8xf32>
    %341 = arith.subf %337, %340 : vector<8x8xf32>
    %342 = math.exp %341 : vector<8x8xf32>
    %cst_63 = arith.constant dense<0.000000e+00> : vector<8xf32>
    %343 = vector.multi_reduction <add>, %342, %cst_63 [1] : vector<8x8xf32> to vector<8xf32>
    %344 = vector.shape_cast %343 : vector<8xf32> to vector<8x1xf32>
    %345 = tpu.reciprocal %344 {approx = true} : vector<8x1xf32> -> vector<8x1xf32>
    %346 = vector.broadcast %345 : vector<8x1xf32> to vector<8x8xf32>
    %347 = arith.mulf %342, %346 : vector<8x8xf32>
    %348 = vector.extract_strided_slice %308 {offsets = [0, 2], sizes = [8, 1], strides = [1, 1]} : vector<8x4xf32> to vector<8x1xf32>
    %349 = vector.broadcast %348 : vector<8x1xf32> to vector<8x8xf32>
    %350 = arith.mulf %347, %349 : vector<8x8xf32>
    %351 = vector.extract_strided_slice %305 {offsets = [0, 24], sizes = [8, 8], strides = [1, 1]} : vector<8x128xf32> to vector<8x8xf32>
    %cst_64 = arith.constant dense<0xFF800000> : vector<8xf32>
    %352 = vector.multi_reduction <maximumf>, %351, %cst_64 [1] : vector<8x8xf32> to vector<8xf32>
    %353 = vector.shape_cast %352 : vector<8xf32> to vector<8x1xf32>
    %354 = vector.broadcast %353 : vector<8x1xf32> to vector<8x8xf32>
    %355 = arith.subf %351, %354 : vector<8x8xf32>
    %356 = math.exp %355 : vector<8x8xf32>
    %cst_65 = arith.constant dense<0.000000e+00> : vector<8xf32>
    %357 = vector.multi_reduction <add>, %356, %cst_65 [1] : vector<8x8xf32> to vector<8xf32>
    %358 = vector.shape_cast %357 : vector<8xf32> to vector<8x1xf32>
    %359 = tpu.reciprocal %358 {approx = true} : vector<8x1xf32> -> vector<8x1xf32>
    %360 = vector.broadcast %359 : vector<8x1xf32> to vector<8x8xf32>
    %361 = arith.mulf %356, %360 : vector<8x8xf32>
    %362 = vector.extract_strided_slice %308 {offsets = [0, 3], sizes = [8, 1], strides = [1, 1]} : vector<8x4xf32> to vector<8x1xf32>
    %363 = vector.broadcast %362 : vector<8x1xf32> to vector<8x8xf32>
    %364 = arith.mulf %361, %363 : vector<8x8xf32>
    %cst_66 = arith.constant 0.000000e+00 : f32
    %365 = vector.broadcast %cst_66 : f32 to vector<8x96xf32>
    %366 = tpu.concatenate %322, %336, %350, %364, %365 in 1 : vector<8x8xf32>, vector<8x8xf32>, vector<8x8xf32>, vector<8x8xf32>, vector<8x96xf32> -> vector<8x128xf32>
    %c0_67 = arith.constant 0 : index
    %c0_68 = arith.constant 0 : index
    %367 = vector.load %arg11[%c0_67, %c0_68] : memref<8x128xf32, #tpu.memory_space<vmem>>, vector<8x128xf32>
    tpu.vector_store %arg11[%c0_67, %c0_68], %366 {strides = array<i32>} : memref<8x128xf32, #tpu.memory_space<vmem>>, vector<8x128xf32>,
    return
  }
}

</mosaic_0001>

<bundles_post_ra>
// kernel: tpu_custom_call.1
= control target key start
LH: loop header
LB: loop body
LE: loop exit
PB: predicated region body
PF: predicated region fallthrough
CT: control target
= control target key end

     0   :  { %16 = vsyncpa [#allocation3], 0  ;;  %s2482_s0 = inlined_call_operand.vmem [shape: bf16[64,8], index: 0, kind: input, shape index: {}]   ;;  %s2483_s1 = inlined_call_operand.vmem [shape: f32[64,1], index: 1, kind: input, shape index: {}]   ;;  %s2484_s2 = inlined_call_operand.vmem [shape: bf16[8,384], index: 2, kind: input, shape index: {}]   ;;  %s2485_s3 = inlined_call_operand.hbm [shape: bf16[128,384], index: 3, kind: input, shape index: {}]   ;;  %s2486_s4 = inlined_call_operand.vmem [shape: f32[1,384], index: 4, kind: input, shape index: {}]   ;;  %s2487_s5 = inlined_call_operand.vmem [shape: f32[1,128], index: 5, kind: input, shape index: {}]   ;;  %s2488_s6 = inlined_call_operand.vmem [shape: bf16[128,128], index: 6, kind: input, shape index: {}]   ;;  %s2489_s7 = inlined_call_operand.vmem [shape: f32[1,128], index: 7, kind: input, shape index: {}]   ;;  %s2490_s8 = inlined_call_operand.hbm [shape: bf16[128,128], index: 8, kind: input, shape index: {}]   ;;  %s2491_s9 = inlined_call_operand.vmem [shape: f32[1,128], index: 9, kind: input, shape index: {}]   ;;  %s2492_s10 = inlined_call_operand.vmem [shape: f32[8,4], index: 10, kind: input, shape index: {}]   ;;  %s2493_s11 = inlined_call_operand.hbm [shape: f32[8,128], index: 11, kind: output, shape index: {}]  }
   0x1   :  { %17 = vsyncpa [#allocation6], 0 }
   0x2   :  { %18 = vsyncpa [#allocation4], 0  ;;  %s29_s19 = sshll.u32 %s2485_s3, 4  ;;  %s1886_s20 = smov [#allocation2]   ;;  %s30_s19 = int_to_ptr.hbm [resolvable:$true] %s29_s19 }
   0x3   :  { %s31_s21 = sshll.u32 %s1886_s20, 4  ;;  %s50_s24 = sshll.u32 %s2490_s8, 4  ;;  %s32_s21 = int_to_ptr.vmem [resolvable:$true] %s31_s21  ;;  %s51_s24 = int_to_ptr.hbm [resolvable:$true] %s50_s24 }
   0x4   :  { %s1887_s25 = smov 192   ;;  %s1888_s26 = smov 12  }
   0x5   :  { %37 = dma.hbm_to_vmem [thread:$0]  %s30_s19, 3072, %s32_s21, [#allocation3], %s1887_s25, %s1887_s25, %s1888_s26  }
   0x6   :  { %s1889_s27 = smov [#allocation5]   ;;  %s1890_s29 = smov 64  }
   0x7   :  { %s52_s28 = sshll.u32 %s1889_s27, 4  ;;  %s1891_s30 = smov 4   ;;  %s53_s28 = int_to_ptr.vmem [resolvable:$true] %s52_s28 }
   0x8   :  { %58 = dma.hbm_to_vmem [thread:$0]  %s51_s24, 1024, %s53_s28, [#allocation6], %s1890_s29, %s1890_s29, %s1891_s30  }
   0x9   :  { %1880 = dma.done.wait [#allocation3], 3072  }
   0xa   :  { %1881 = vsyncadd [#allocation3], 4294964224 }
   0xb   :  { %1882 = dma.done.wait [#allocation6], 1024  }
   0xc   :  { %1883 = vsyncadd [#allocation6], 4294966272  ;;  %v1553_v0 = vld [vmem:[#allocation2 + $0xa8] sm:$0xf]  ;;  %v1669_v1 = vld [vmem:[#allocation2 + $0xb0] sm:$0xf0] }
   0xd   :  { %v80_v2 = vld [vmem:[%s2484_s2] sm:$0xff]  ;;  %v1969_v3 = vor.u32 %v1669_v1, %v1553_v0  ;;  %v1541_v5 = vld [vmem:[#allocation2 + $0x90] sm:$0xf]  ;;  %v1666_v6 = vld [vmem:[#allocation2 + $0x98] sm:$0xf0]  ;;  %v1892_v7 = vmov 0  }
   0xe   :  { %v112_v4 = vunpack.c.l.b16 %v80_v2  ;;  %1701 = vset.pattern.permute.xlu0 %v1892_v7  ;;  %1702 = vset.pattern.permute.xlu1 %v1892_v7  ;;  %vm131_vm0 = vcmask 1043456   ;;  %v1975_v9 = vor.u32 %v1666_v6, %v1541_v5  ;;  %v1529_v10 = vld [vmem:[#allocation2 + $0x78] sm:$0xf]  ;;  %v1663_v11 = vld [vmem:[#allocation2 + $0x80] sm:$0xf0]  ;;  %vm118_vm1 = vcmask 64512  }
   0xf   :  { %1703 = vset.pattern.permute.xlu2 %v1892_v7  ;;  %397 = vmatpush.bf16.msra.mxu3 %v1969_v3  ;;  %v1561_v12 = vld [vmem:[#allocation2 + $0xb0] sm:$0xf]  ;;  %v1981_v14 = vld [vmem:[%s2482_s0] sm:$0xff]  ;;  %v1670_v15 = vld [vmem:[#allocation2 + $0xb8] sm:$0xf0]  ;;  %v1986_v17 = vor.u32 %v1663_v11, %v1529_v10  ;;  %v113_v36 = vunpack.c.h.b16 %v80_v2  ;;  %s1895_s14 = smov 104  }
  0x10   :  { %v115_v8 = vpack.c.b16 %v112_v4, %v112_v4  ;;  %v1983_v16 = vor.u32 %v1670_v15, %v1561_v12  ;;  %v1549_v18 = vld [vmem:[#allocation2 + $0x98] sm:$0xf]  ;;  %v1517_v19 = vld [vmem:[#allocation2 + $0x60] sm:$0xf]  ;;  %v1660_v20 = vld [vmem:[#allocation2 + $0x68] sm:$0xf0] }
  0x11   :  { %v1667_v21 = vld [vmem:[#allocation2 + $0xa0] sm:$0xf0]  ;;  %v1537_v23 = vld [vmem:[#allocation2 + $0x80] sm:$0xf]  ;;  %v1664_v24 = vld [vmem:[#allocation2 + $0x88] sm:$0xf0]  ;;  %v1994_v25 = vor.u32 %v1660_v20, %v1517_v19  ;;  %v116_v40 = vpack.c.b16 %v113_v36, %v113_v36 }
  0x12   :  { %v133_v13 = vsel %vm131_vm0, %v115_v8, 0  ;;  %v1991_v22 = vor.u32 %v1667_v21, %v1549_v18  ;;  %v1505_v26 = vld [vmem:[#allocation2 + $0x48] sm:$0xf]  ;;  %v1657_v27 = vld [vmem:[#allocation2 + $0x50] sm:$0xf0]  ;;  %v1997_v28 = vor.u32 %v1664_v24, %v1537_v23  ;;  %s1899_s15 = smov [#allocation7]  }
  0x13   :  { %148 = vmatpush.bf16.msra.mxu0 %v133_v13  ;;  %398 = vmatpush.bf16.msra.mxu3 %v1975_v9  ;;  %v2000_v29 = vor.u32 %v1657_v27, %v1505_v26  ;;  %v1493_v30 = vld [vmem:[#allocation2 + $0x30] sm:$0xf]  ;;  %v1654_v31 = vld [vmem:[#allocation2 + $0x38] sm:$0xf0]  ;;  %v1525_v32 = vld [vmem:[#allocation2 + $0x68] sm:$0xf] }
  0x14   :  { %v1661_v33 = vld [vmem:[#allocation2 + $0x70] sm:$0xf0]  ;;  %v2006_v35 = vor.u32 %v1654_v31, %v1493_v30  ;;  %v1481_v37 = vld [vmem:[#allocation2 + $0x18] sm:$0xf]  ;;  %v1651_v38 = vld [vmem:[#allocation2 + $0x20] sm:$0xf0] }
  0x15   :  { %v2003_v34 = vor.u32 %v1661_v33, %v1525_v32  ;;  %v2012_v39 = vld [vmem:[%s2482_s0 + $0x8] sm:$0xff]  ;;  %v2015_v41 = vor.u32 %v1651_v38, %v1481_v37  ;;  %v136_v42 = vsel %vm131_vm0, %v116_v40, 0  ;;  %v1513_v43 = vld [vmem:[#allocation2 + $0x50] sm:$0xf]  ;;  %v1658_v44 = vld [vmem:[#allocation2 + $0x58] sm:$0xf0] }
  0x16   :  { %1455 = vmatmul.msk.bf16.vlgmr.msra.gmra.mxu0 %vm118_vm1, %v1981_v14  ;;  %v1469_v45 = vld [vmem:[#allocation2] sm:$0xf]  ;;  %v1648_v46 = vld [vmem:[#allocation2 + $0x8] sm:$0xf0]  ;;  %177 = vmatpush.bf16.msra.mxu1 %v136_v42  ;;  %v2018_v47 = vor.u32 %v1658_v44, %v1513_v43  ;;  %v1555_v49 = vld [vmem:[#allocation2 + $0xb4] sm:$0xf0] }
  0x17   :  { %423 = vmatpush.bf16.msrb.mxu0 %v1983_v16  ;;  %399 = vmatpush.bf16.msra.mxu3 %v1986_v17  ;;  %v1668_v48 = vld [vmem:[#allocation2 + $0xac] sm:$0xf]  ;;  %v2025_v50 = vor.u32 %v1648_v46, %v1469_v45  ;;  %v1501_v51 = vld [vmem:[#allocation2 + $0x38] sm:$0xf]  ;;  %v1655_v52 = vld [vmem:[#allocation2 + $0x40] sm:$0xf0] }
  0x18   :  { %v2029_v53 = vor.u32 %v1668_v48, %v1555_v49  ;;  %v2031_v54 = vor.u32 %v1655_v52, %v1501_v51  ;;  %v81_v55 = vld [vmem:[%s2484_s2 + $0x8] sm:$0xf]  ;;  %v1665_v56 = vld [vmem:[#allocation2 + $0x94] sm:$0xf]  ;;  %v1543_v57 = vld [vmem:[#allocation2 + $0x9c] sm:$0xf0] }
  0x19   :  { %1459 = vmatmul.msk.bf16.vlgmr.msra.gmra.mxu1 %vm118_vm1, %v1981_v14  ;;  %v114_v58 = vunpack.c.l.b16 %v81_v55  ;;  %v1489_v60 = vld [vmem:[#allocation2 + $0x20] sm:$0xf]  ;;  %v1652_v61 = vld [vmem:[#allocation2 + $0x28] sm:$0xf0]  ;;  %v2040_v62 = vor.u32 %v1665_v56, %v1543_v57  ;;  %v1477_v0 = vld [vmem:[#allocation2 + $0x8] sm:$0xf] }
  0x1a   :  { %495 = vmatpush.bf16.msrb.mxu1 %v1969_v3  ;;  %v2042_v63 = vor.u32 %v1652_v61, %v1489_v60  ;;  %v1649_v1 = vld [vmem:[#allocation2 + $0x10] sm:$0xf0]  ;;  %v1662_v2 = vld [vmem:[#allocation2 + $0x7c] sm:$0xf]  ;;  %v1531_v4 = vld [vmem:[#allocation2 + $0x84] sm:$0xf0] }
  0x1b   :  { %424 = vmatpush.bf16.msrb.mxu0 %v1991_v22  ;;  %400 = vmatpush.bf16.msra.mxu3 %v1994_v25  ;;  %v117_v59 = vpack.c.b16 %v114_v58, %v114_v58  ;;  %v2048_v6 = vor.u32 %v1649_v1, %v1477_v0  ;;  %v2052_v8 = vor.u32 %v1662_v2, %v1531_v4  ;;  %v2057_v10 = vld [vmem:[%s2482_s0 + $0x10] sm:$0xff]  ;;  %v1659_v11 = vld [vmem:[#allocation2 + $0x64] sm:$0xf]  ;;  %v1656_v15 = vld [vmem:[#allocation2 + $0x4c] sm:$0xf]  ;;  %s1428_s2 = sshll.u32 %s2493_s11, 4  ;;  %s1429_s2 = int_to_ptr.hbm [resolvable:$true] %s1428_s2 }
  0x1c   :  { %v1519_v12 = vld [vmem:[#allocation2 + $0x6c] sm:$0xf0]  ;;  %v1507_v18 = vld [vmem:[#allocation2 + $0x54] sm:$0xf0]  ;;  %v1653_v20 = vld [vmem:[#allocation2 + $0x34] sm:$0xf] }
  0x1d   :  { %v139_v5 = vsel %vm131_vm0, %v117_v59, 0  ;;  %v2065_v13 = vor.u32 %v1659_v11, %v1519_v12  ;;  %v2078_v19 = vor.u32 %v1656_v15, %v1507_v18  ;;  %v1495_v21 = vld [vmem:[#allocation2 + $0x3c] sm:$0xf0]  ;;  %v262_v23 = vld [vmem:[%s2483_s1 + $0x8] sm:$0xff]  ;;  %v1650_v26 = vld [vmem:[#allocation2 + $0x1c] sm:$0xf] }
  0x1e   :  { %496 = vmatpush.bf16.msrb.mxu1 %v1975_v9  ;;  %206 = vmatpush.bf16.msra.mxu2 %v139_v5  ;;  %v2087_v24 = vor.u32 %v1653_v20, %v1495_v21  ;;  %v1483_v27 = vld [vmem:[#allocation2 + $0x24] sm:$0xf0]  ;;  %v1646_v31 = vld [vmem:[%s2482_s0 + $0x18] sm:$0xff]  ;;  %v1647_v32 = vld [vmem:[#allocation2 + $0x4] sm:$0xf] }
  0x1f   :  { %425 = vmatpush.bf16.msrb.mxu0 %v1997_v28  ;;  %401 = vmatpush.bf16.msra.mxu3 %v2000_v29  ;;  %v2093_v30 = vor.u32 %v1650_v26, %v1483_v27  ;;  %v1471_v33 = vld [vmem:[#allocation2 + $0xc] sm:$0xf0]  ;;  %v82_v38 = vld [vmem:[%s2486_s4] sm:$0x7] }
  0x20   :  { %v267_v36 = vld [vmem:[%s2483_s1 + $0x30] sm:$0xff]  ;;  %v2108_v37 = vor.u32 %v1647_v32, %v1471_v33  ;;  %v2180_v2 = vperm.slane %v82_v38, 1  ;;  %v2188_v32 = vld [vmem:[%s2487_s5] ss:$0 sm:$0xff] }
  0x21   :  { %1463 = vmatmul.msk.bf16.vlgmr.msra.gmra.mxu2 %vm118_vm1, %v1981_v14  ;;  %v261_v14 = vld [vmem:[%s2483_s1] sm:$0xff] }
  0x22   :  { %497 = vmatpush.bf16.msrb.mxu1 %v1986_v17  ;;  %508 = vmatpush.bf16.msrb.mxu2 %v2029_v53 }
  0x23   :  { %426 = vmatpush.bf16.msrb.mxu0 %v2003_v34  ;;  %402 = vmatpush.bf16.msra.mxu3 %v2006_v35 }
  0x24   :  { %489 = vperm.xlu0 %1701, %v261_v14  }
  0x26   :  { %1456 = vmatmul.msk.bf16.gmra.mxu0 %vm118_vm1, %v2012_v39  ;;  %498 = vmatpush.bf16.msrb.mxu1 %v1994_v25 }
  0x27   :  { %427 = vmatpush.bf16.msrb.mxu0 %v2018_v47  ;;  %403 = vmatpush.bf16.msra.mxu3 %v2015_v41 }
  0x28   :  { %509 = vmatpush.bf16.msrb.mxu2 %v2040_v62 }
  0x29   :  { %1460 = vmatmul.msk.bf16.gmra.mxu1 %vm118_vm1, %v2012_v39 }
  0x2a   :  { %499 = vmatpush.bf16.msrb.mxu1 %v2000_v29 }
  0x2b   :  { %428 = vmatpush.bf16.msrb.mxu0 %v2031_v54  ;;  %404 = vmatpush.bf16.msra.mxu3 %v2025_v50 }
  0x2c   :  { %510 = vmatpush.bf16.msrb.mxu2 %v2052_v8  ;;  %584 = vperm.xlu0 %1701, %v262_v23  }
  0x2e   :  { %405 = vmatmul.bf16.vlgmr.msra.gmra.mxu3 %v1892_v7  ;;  %500 = vmatpush.bf16.msrb.mxu1 %v2006_v35 }
  0x2f   :  { %410 = vmatpush.bf16.msrb.mxu3 %v2029_v53  ;;  %429 = vmatpush.bf16.msrb.mxu0 %v2042_v63 }
  0x30   :  { %511 = vmatpush.bf16.msrb.mxu2 %v2065_v13 }
  0x31   :  { %1464 = vmatmul.msk.bf16.gmra.mxu2 %vm118_vm1, %v2012_v39  ;;  %v84_v39 = vperm.slane %v82_v38, 0 }
  0x32   :  { %501 = vmatpush.bf16.msrb.mxu1 %v2015_v41 }
  0x33   :  { %411 = vmatpush.bf16.msrb.mxu3 %v2040_v62  ;;  %430 = vmatpush.bf16.msrb.mxu0 %v2048_v6 }
  0x34   :  { %512 = vmatpush.bf16.msrb.mxu2 %v2078_v19  ;;  %1064 = vperm.xlu0 %1701, %v267_v36  }
  0x36   :  { %1457 = vmatmul.msk.bf16.gmra.mxu0 %vm118_vm1, %v2057_v10  ;;  %502 = vmatpush.bf16.msrb.mxu1 %v2025_v50 }
  0x37   :  { %412 = vmatpush.bf16.msrb.mxu3 %v2052_v8  ;;  %591 = vmatpush.bf16.msra.mxu0 %v1969_v3 }
  0x38   :  { %513 = vmatpush.bf16.msrb.mxu2 %v2087_v24 }
  0x39   :  { %1461 = vmatmul.msk.bf16.gmra.mxu1 %vm118_vm1, %v2057_v10 }
  0x3a   :  { %604 = vmatpush.bf16.msra.mxu1 %v2029_v53 }
  0x3b   :  { %413 = vmatpush.bf16.msrb.mxu3 %v2065_v13  ;;  %592 = vmatpush.bf16.msra.mxu0 %v1975_v9 }
  0x3c   :  { %514 = vmatpush.bf16.msrb.mxu2 %v2093_v30 }
  0x3e   :  { %605 = vmatpush.bf16.msra.mxu1 %v2040_v62 }
  0x3f   :  { %414 = vmatpush.bf16.msrb.mxu3 %v2078_v19  ;;  %593 = vmatpush.bf16.msra.mxu0 %v1986_v17 }
  0x40   :  { %515 = vmatpush.bf16.msrb.mxu2 %v2108_v37 }
  0x41   :  { %1465 = vmatmul.msk.bf16.gmra.mxu2 %vm118_vm1, %v2057_v10 }
  0x42   :  { %606 = vmatpush.bf16.msra.mxu1 %v2052_v8 }
  0x43   :  { %415 = vmatpush.bf16.msrb.mxu3 %v2087_v24  ;;  %594 = vmatpush.bf16.msra.mxu0 %v1994_v25 }
  0x44   :  { %617 = vmatpush.bf16.msra.mxu2 %v1983_v16 }
  0x46   :  { %1458 = vmatmul.msk.bf16.gmra.mxu0 %vm118_vm1, %v1646_v31  ;;  %607 = vmatpush.bf16.msra.mxu1 %v2065_v13 }
  0x47   :  { %416 = vmatpush.bf16.msrb.mxu3 %v2093_v30  ;;  %595 = vmatpush.bf16.msra.mxu0 %v2000_v29 }
  0x48   :  { %618 = vmatpush.bf16.msra.mxu2 %v1991_v22 }
  0x49   :  { %1462 = vmatmul.msk.bf16.gmra.mxu1 %vm118_vm1, %v1646_v31 }
  0x4a   :  { %608 = vmatpush.bf16.msra.mxu1 %v2078_v19 }
  0x4b   :  { %417 = vmatpush.bf16.msrb.mxu3 %v2108_v37  ;;  %596 = vmatpush.bf16.msra.mxu0 %v2006_v35 }
  0x4c   :  { %619 = vmatpush.bf16.msra.mxu2 %v1997_v28 }
  0x4e   :  { %418 = vmatmul.bf16.vlgmr.msrb.gmra.mxu3 %v1892_v7  ;;  %609 = vmatpush.bf16.msra.mxu1 %v2087_v24 }
  0x4f   :  { %521 = vmatpush.bf16.msra.mxu3 %v1983_v16  ;;  %597 = vmatpush.bf16.msra.mxu0 %v2015_v41 }
  0x50   :  { %620 = vmatpush.bf16.msra.mxu2 %v2003_v34 }
  0x51   :  { %1466 = vmatmul.msk.bf16.gmra.mxu2 %vm118_vm1, %v1646_v31 }
  0x52   :  { %610 = vmatpush.bf16.msra.mxu1 %v2093_v30 }
  0x53   :  { %522 = vmatpush.bf16.msra.mxu3 %v1991_v22  ;;  %598 = vmatpush.bf16.msra.mxu0 %v2025_v50 }
  0x54   :  { %621 = vmatpush.bf16.msra.mxu2 %v2018_v47 }
  0x56   :  { %431 = vmatmul.bf16.vlgmr.msrb.gmra.mxu0 %v1892_v7  ;;  %611 = vmatpush.bf16.msra.mxu1 %v2108_v37 }
  0x57   :  { %523 = vmatpush.bf16.msra.mxu3 %v1997_v28  ;;  %700 = vmatpush.bf16.msrb.mxu0 %v2029_v53 }
  0x58   :  { %622 = vmatpush.bf16.msra.mxu2 %v2031_v54 }
  0x5b   :  { %524 = vmatpush.bf16.msra.mxu3 %v2003_v34  ;;  %701 = vmatpush.bf16.msrb.mxu0 %v2040_v62 }
  0x5c   :  { %623 = vmatpush.bf16.msra.mxu2 %v2042_v63 }
  0x5f   :  { %525 = vmatpush.bf16.msra.mxu3 %v2018_v47  ;;  %702 = vmatpush.bf16.msrb.mxu0 %v2052_v8 }
  0x60   :  { %624 = vmatpush.bf16.msra.mxu2 %v2048_v6 }
  0x63   :  { %526 = vmatpush.bf16.msra.mxu3 %v2031_v54  ;;  %703 = vmatpush.bf16.msrb.mxu0 %v2065_v13 }
  0x67   :  { %527 = vmatpush.bf16.msra.mxu3 %v2042_v63  ;;  %704 = vmatpush.bf16.msrb.mxu0 %v2078_v19 }
  0x6b   :  { %528 = vmatpush.bf16.msra.mxu3 %v2048_v6  ;;  %705 = vmatpush.bf16.msrb.mxu0 %v2087_v24 }
  0x6f   :  { %687 = vmatpush.bf16.msrb.mxu3 %v1969_v3  ;;  %706 = vmatpush.bf16.msrb.mxu0 %v2093_v30 }
  0x73   :  { %688 = vmatpush.bf16.msrb.mxu3 %v1975_v9  ;;  %707 = vmatpush.bf16.msrb.mxu0 %v2108_v37 }
  0x77   :  { %689 = vmatpush.bf16.msrb.mxu3 %v1986_v17 }
  0x7b   :  { %690 = vmatpush.bf16.msrb.mxu3 %v1994_v25 }
  0x7f   :  { %691 = vmatpush.bf16.msrb.mxu3 %v2000_v29 }
  0x83   :  { %692 = vmatpush.bf16.msrb.mxu3 %v2006_v35 }
  0x87   :  { %693 = vmatpush.bf16.msrb.mxu3 %v2015_v41 }
  0x8b   :  { %694 = vmatpush.bf16.msrb.mxu3 %v2025_v50 }
  0x93   :  { %v150_v7 = vpop.f32.mrf.mxu0 }
  0x94   :  { %v151_v48 = vadd.f32 %v150_v7, %v84_v39 }
  0x96   :  { %v179_v5 = vpop.f32.mrf.mxu1 }
  0x97   :  { %v180_v11 = vadd.f32 %v179_v5, %v2180_v2 }
  0x9b   :  { %v152_v40 = vpop.f32.mrf.mxu0 }
  0x9c   :  { %v2168_v42 = vadd.f32 %v152_v40, %v84_v39 }
  0xa3   :  { %v155_v43 = vpop.f32.mrf.mxu0 }
  0xa4   :  { %v2170_v44 = vadd.f32 %v155_v43, %v84_v39 }
  0xab   :  { %v157_v45 = vpop.f32.mrf.mxu0 }
  0xac   :  { %v2172_v46 = vadd.f32 %v157_v45, %v84_v39 }
  0xb1   :  { %v406_v49 = vpop.f32.mrf.mxu3 }
  0xb2   :  { %v436_v51 = vadd.f32 %v406_v49, %v151_v48  ;;  %v2191_v48 = vperm.slane %v82_v38, 2 }
  0xb3   :  { %v160_v52 = vpop.f32.mrf.mxu0 }
  0xb4   :  { %v2174_v55 = vadd.f32 %v160_v52, %v84_v39  ;;  %v1563_v56 = vmul.f32 -1.442695, %v436_v51  ;;  %v208_v51 = vpop.f32.mrf.mxu2 }
  0xb6   :  { %1711 = vpow2.f32 %v1563_v56 }
  0xb9   :  { %v408_v57 = vpop.f32.mrf.mxu3 }
  0xba   :  { %v209_v57 = vadd.f32 %v208_v51, %v2191_v48 }
  0xbb   :  { %v162_v58 = vpop.f32.mrf.mxu0 }
  0xbc   :  { %v2176_v59 = vadd.f32 %v162_v58, %v84_v39  ;;  %v1712_v60 = vpop.eup %1711 }
  0xbd   :  { %v440_v61 = vadd.f32 1.0, %v1712_v60 }
  0xbf   :  { %1713 = vrcp.f32 %v440_v61  ;;  %v452_v36 = vand.u32 2147483648, %v440_v61  ;;  %vm446_vm3 = vweird.f32 %v440_v61 }
  0xc1   :  { %v453_v49 = vor.u32 1.1754944e-38, %v452_v36  ;;  %v181_v36 = vpop.f32.mrf.mxu1 }
  0xc3   :  { %v165_v0 = vpop.f32.mrf.mxu0 }
  0xc4   :  { %v2178_v1 = vadd.f32 %v165_v0, %v84_v39 }
  0xc5   :  { %v1714_v4 = vpop.eup %1713 }
  0xc6   :  { %v442_v15 = vmul.f32 %v1714_v4, %v440_v61  ;;  %vm447_vm2 = vweird.f32 %v1714_v4 }
  0xc7   :  { %vm448_vm4 = vmor %vm446_vm3, %vm447_vm2 }
  0xc8   :  { %v443_v20 = vsub.f32 1.0, %v442_v15 }
  0xca   :  { %v444_v26 = vmul.f32 %v1714_v4, %v443_v20 }
  0xcb   :  { %v167_v10 = vpop.f32.mrf.mxu0 }
  0xcc   :  { %v2183_v12 = vadd.f32 %v167_v10, %v84_v39  ;;  %v445_v31 = vadd.f32 %v1714_v4, %v444_v26  ;;  %v450_v39 = vand.u32 2147483647, %v440_v61 }
  0xce   :  { %2494 = vst [vmem:[#allocation11_spill] sm:$0xff] %v2183_v12  ;;  %v449_v43 = vsel %vm448_vm4, %v1714_v4, %v445_v31  ;;  %vm451_vm5 = vcmp.eq.f32.partialorder %v450_v39, 8.507059e+37  ;;  %v2222_v39 = vpop.f32.mrf.mxu1 }
  0xcf   :  { %v454_v52 = vsel %vm451_vm5, %v453_v49, %v449_v43 }
  0xd1   :  { %v419_v18 = vpop.f32.mrf.mxu3 }
  0xd2   :  { %v456_v14 = vadd.f32 %v419_v18, %v180_v11 }
  0xd3   :  { %v432_v23 = vpop.f32.mrf.mxu0 }
  0xd4   :  { %v1564_v21 = vmul.f32 -1.442695, %v456_v14  ;;  %v479_v45 = vadd.f32 %v2188_v32, %v432_v23 }
  0xd6   :  { %1715 = vpow2.f32 %v1564_v21  ;;  %v480_v56 = vmul.f32 %v479_v45, %v454_v52  ;;  %v2226_v43 = vpop.f32.mrf.mxu1 }
  0xd8   :  { %v481_v0 = vadd.f32 %v480_v56, %v209_v57 }
  0xd9   :  { %v421_v27 = vpop.f32.mrf.mxu3 }
  0xda   :  { %v490_v27 = vpop.permute.xlu0 %489 }
  0xdb   :  { %v434_v40 = vpop.f32.mrf.mxu0 }
  0xdc   :  { %v1716_v33 = vpop.eup %1715 }
  0xdd   :  { %v460_v7 = vadd.f32 1.0, %v1716_v33 }
  0xde   :  { %v2230_v49 = vpop.f32.mrf.mxu1 }
  0xdf   :  { %1717 = vrcp.f32 %v460_v7  ;;  %v472_v61 = vand.u32 2147483648, %v460_v7  ;;  %v470_v11 = vand.u32 2147483647, %v460_v7  ;;  %vm466_vm7 = vweird.f32 %v460_v7 }
  0xe0   :  { %1719 = vtanh.f32 %v481_v0 }
  0xe1   :  { %v473_v38 = vor.u32 1.1754944e-38, %v472_v61  ;;  %vm471_vm9 = vcmp.eq.f32.partialorder %v470_v11, 8.507059e+37  ;;  %v182_v11 = vadd.f32 %v181_v36, %v2180_v2  ;;  %v263_v36 = vld [vmem:[%s2483_s1 + $0x10] sm:$0xff] }
  0xe2   :  { %680 = vperm.xlu1 %1702, %v263_v36  }
  0xe5   :  { %v1718_v58 = vpop.eup %1717 }
  0xe6   :  { %v462_v60 = vmul.f32 %v1718_v58, %v460_v7  ;;  %vm467_vm6 = vweird.f32 %v1718_v58  ;;  %v1720_v20 = vpop.eup %1719  ;;  %v210_v7 = vpop.f32.mrf.mxu2 }
  0xe7   :  { %vm468_vm8 = vmor %vm466_vm7, %vm467_vm6  ;;  %v2234_v52 = vpop.f32.mrf.mxu1 }
  0xe8   :  { %v463_v5 = vsub.f32 1.0, %v462_v60 }
  0xea   :  { %v464_v10 = vmul.f32 %v1718_v58, %v463_v5 }
  0xec   :  { %v465_v4 = vadd.f32 %v1718_v58, %v464_v10 }
  0xee   :  { %v469_v15 = vsel %vm468_vm8, %v1718_v58, %v465_v4  ;;  %v2224_v40 = vpop.f32.mrf.mxu2 }
  0xef   :  { %v474_v18 = vsel %vm471_vm9, %v473_v38, %v469_v15  ;;  %v2238_v57 = vpop.f32.mrf.mxu1 }
  0xf0   :  { %v483_v14 = vsub.f32 1.0, %v474_v18  ;;  %v485_v23 = vmul.f32 0.0, %v474_v18 }
  0xf2   :  { %v484_v21 = vmul.f32 %v1720_v20, %v483_v14 }
  0xf4   :  { %v486_v26 = vadd.f32 %v485_v23, %v484_v21 }
  0xf6   :  { %v2194_v31 = vmul.f32 %v490_v27, %v486_v26  ;;  %v2228_v45 = vpop.f32.mrf.mxu2 }
  0xf7   :  { %v2242_v60 = vpop.f32.mrf.mxu1 }
  0xf8   :  { %v494_v33 = vpack.c.bf16 %v2194_v31, %v2194_v31  ;;  %2495 = vst [vmem:[#allocation12_spill] sm:$0xff] %v2242_v60 }
  0xfa   :  { %503 = vmatmul.bf16.vlgmr.msrb.gmra.mxu1 %v494_v33  ;;  %516 = vmatmul.bf16.vlgmr.msrb.gmra.mxu2 %v494_v33 }
  0xfb   :  { %529 = vmatmul.bf16.vlgmr.msra.gmra.mxu3 %v494_v33  ;;  %713 = vmatpush.bf16.msrb.mxu1 %v1983_v16 }
  0xfc   :  { %783 = vmatpush.bf16.msrb.mxu2 %v1969_v3  ;;  %796 = vmatpush.bf16.msra.mxu3 %v2029_v53 }
  0xfe   :  { %v2232_v51 = vpop.f32.mrf.mxu2 }
  0xff   :  { %714 = vmatpush.bf16.msrb.mxu1 %v1991_v22 }
 0x100   :  { %784 = vmatpush.bf16.msrb.mxu2 %v1975_v9  ;;  %797 = vmatpush.bf16.msra.mxu3 %v2040_v62 }
 0x103   :  { %715 = vmatpush.bf16.msrb.mxu1 %v1997_v28 }
 0x104   :  { %785 = vmatpush.bf16.msrb.mxu2 %v1986_v17  ;;  %798 = vmatpush.bf16.msra.mxu3 %v2052_v8 }
 0x106   :  { %v2236_v56 = vpop.f32.mrf.mxu2 }
 0x107   :  { %716 = vmatpush.bf16.msrb.mxu1 %v2003_v34 }
 0x108   :  { %786 = vmatpush.bf16.msrb.mxu2 %v1994_v25  ;;  %799 = vmatpush.bf16.msra.mxu3 %v2065_v13 }
 0x10b   :  { %717 = vmatpush.bf16.msrb.mxu1 %v2018_v47 }
 0x10c   :  { %787 = vmatpush.bf16.msrb.mxu2 %v2000_v29  ;;  %800 = vmatpush.bf16.msra.mxu3 %v2078_v19 }
 0x10e   :  { %v2240_v58 = vpop.f32.mrf.mxu2 }
 0x10f   :  { %718 = vmatpush.bf16.msrb.mxu1 %v2031_v54 }
 0x110   :  { %788 = vmatpush.bf16.msrb.mxu2 %v2006_v35  ;;  %801 = vmatpush.bf16.msra.mxu3 %v2087_v24 }
 0x113   :  { %719 = vmatpush.bf16.msrb.mxu1 %v2042_v63 }
 0x114   :  { %789 = vmatpush.bf16.msrb.mxu2 %v2015_v41  ;;  %802 = vmatpush.bf16.msra.mxu3 %v2093_v30 }
 0x116   :  { %v2244_v0 = vpop.f32.mrf.mxu2 }
 0x117   :  { %720 = vmatpush.bf16.msrb.mxu1 %v2048_v6  ;;  %2496 = vst [vmem:[#allocation13_spill] sm:$0xff] %v2244_v0 }
 0x118   :  { %790 = vmatpush.bf16.msrb.mxu2 %v2025_v50  ;;  %803 = vmatpush.bf16.msra.mxu3 %v2108_v37 }
 0x177   :  { %v504_v5 = vpop.f32.mrf.mxu1 }
 0x178   :  { %v534_v61 = vadd.f32 %v504_v5, %v2168_v42 }
 0x17a   :  { %v1565_v10 = vmul.f32 -1.442695, %v534_v61 }
 0x17c   :  { %1721 = vpow2.f32 %v1565_v10 }
 0x17d   :  { %v517_v4 = vpop.f32.mrf.mxu2 }
 0x17e   :  { %v554_v38 = vadd.f32 %v517_v4, %v182_v11  ;;  %v530_v15 = vpop.f32.mrf.mxu3 }
 0x17f   :  { %v506_v18 = vpop.f32.mrf.mxu1 }
 0x180   :  { %v1566_v14 = vmul.f32 -1.442695, %v554_v38 }
 0x182   :  { %v1722_v20 = vpop.eup %1721  ;;  %1723 = vpow2.f32 %v1566_v14 }
 0x183   :  { %v538_v21 = vadd.f32 1.0, %v1722_v20 }
 0x185   :  { %1725 = vrcp.f32 %v538_v21  ;;  %v519_v23 = vpop.f32.mrf.mxu2  ;;  %v550_v61 = vand.u32 2147483648, %v538_v21  ;;  %v548_v11 = vand.u32 2147483647, %v538_v21  ;;  %vm544_vm11 = vweird.f32 %v538_v21 }
 0x186   :  { %v532_v26 = vpop.f32.mrf.mxu3 }
 0x187   :  { %v551_v14 = vor.u32 1.1754944e-38, %v550_v61  ;;  %vm549_vm13 = vcmp.eq.f32.partialorder %v548_v11, 8.507059e+37  ;;  %v574_v26 = vadd.f32 %v2188_v32, %v530_v15 }
 0x188   :  { %v1724_v27 = vpop.eup %1723 }
 0x189   :  { %v558_v33 = vadd.f32 1.0, %v1724_v27  ;;  %v264_v27 = vld [vmem:[%s2483_s1 + $0x18] sm:$0xff] }
 0x18a   :  { %776 = vperm.xlu1 %1702, %v264_v27  }
 0x18b   :  { %v1726_v0 = vpop.eup %1725  ;;  %1727 = vrcp.f32 %v558_v33  ;;  %v570_v12 = vand.u32 2147483648, %v558_v33  ;;  %vm564_vm15 = vweird.f32 %v558_v33 }
 0x18c   :  { %v540_v42 = vmul.f32 %v1726_v0, %v538_v21  ;;  %vm545_vm10 = vweird.f32 %v1726_v0 }
 0x18d   :  { %vm546_vm12 = vmor %vm544_vm11, %vm545_vm10 }
 0x18e   :  { %v541_v5 = vsub.f32 1.0, %v540_v42  ;;  %v211_v42 = vadd.f32 %v210_v7, %v2191_v48  ;;  %v268_v7 = vld [vmem:[%s2483_s1 + $0x38] sm:$0xff] }
 0x190   :  { %v542_v10 = vmul.f32 %v1726_v0, %v541_v5 }
 0x191   :  { %v1728_v4 = vpop.eup %1727 }
 0x192   :  { %v560_v38 = vmul.f32 %v1728_v4, %v558_v33  ;;  %v543_v18 = vadd.f32 %v1726_v0, %v542_v10  ;;  %vm565_vm14 = vweird.f32 %v1728_v4  ;;  %v568_v10 = vand.u32 2147483647, %v558_v33  ;;  %1160 = vperm.xlu1 %1702, %v268_v7  }
 0x193   :  { %vm566_vm0 = vmor %vm564_vm15, %vm565_vm14 }
 0x194   :  { %v561_v20 = vsub.f32 1.0, %v560_v38  ;;  %v547_v23 = vsel %vm546_vm12, %v1726_v0, %v543_v18  ;;  %v571_v0 = vor.u32 1.1754944e-38, %v570_v12  ;;  %vm569_vm2 = vcmp.eq.f32.partialorder %v568_v10, 8.507059e+37 }
 0x195   :  { %v552_v5 = vsel %vm549_vm13, %v551_v14, %v547_v23  ;;  %v1331_v14 = vld [vmem:[%s2492_s10] sm:$0xff]  ;;  %v585_v23 = vpop.permute.xlu0 %584  ;;  %s1426_s10 = sshll.u32 %s1899_s15, 4  ;;  %s1427_s10 = int_to_ptr.vmem [resolvable:$true] %s1426_s10 }
 0x196   :  { %v562_v36 = vmul.f32 %v1728_v4, %v561_v20  ;;  %v575_v60 = vmul.f32 %v574_v26, %v552_v5  ;;  %v2263_v12 = vsub.f32 1.0, %v1331_v14 }
 0x198   :  { %v563_v21 = vadd.f32 %v1728_v4, %v562_v36  ;;  %v576_v61 = vadd.f32 %v575_v60, %v211_v42 }
 0x19a   :  { %v567_v11 = vsel %vm566_vm0, %v1728_v4, %v563_v21  ;;  %1729 = vtanh.f32 %v576_v61  ;;  %1346 = vperm.xlu1 %1702, %v2263_v12  }
 0x19b   :  { %v572_v15 = vsel %vm569_vm2, %v571_v0, %v567_v11 }
 0x19c   :  { %v578_v38 = vsub.f32 1.0, %v572_v15  ;;  %v580_v60 = vmul.f32 %v572_v15, %v2194_v31 }
 0x1a0   :  { %v1730_v18 = vpop.eup %1729 }
 0x1a1   :  { %v579_v20 = vmul.f32 %v1730_v18, %v578_v38 }
 0x1a3   :  { %v581_v33 = vadd.f32 %v580_v60, %v579_v20 }
 0x1a5   :  { %v587_v4 = vsub.f32 %v581_v33, %v2194_v31 }
 0x1a7   :  { %v588_v26 = vmul.f32 %v587_v4, %v585_v23 }
 0x1a9   :  { %v2268_v27 = vadd.f32 %v588_v26, %v2194_v31  ;;  %v185_v31 = vadd.f32 %v2222_v39, %v2180_v2 }
 0x1ab   :  { %v590_v42 = vpack.c.bf16 %v2268_v27, %v2268_v27 }
 0x1ad   :  { %599 = vmatmul.bf16.vlgmr.msra.gmra.mxu0 %v590_v42  ;;  %612 = vmatmul.bf16.vlgmr.msra.gmra.mxu1 %v590_v42 }
 0x1ae   :  { %625 = vmatmul.bf16.vlgmr.msra.gmra.mxu2 %v590_v42  ;;  %809 = vmatpush.bf16.msra.mxu0 %v1983_v16 }
 0x1af   :  { %879 = vmatpush.bf16.msra.mxu1 %v1969_v3  ;;  %892 = vmatpush.bf16.msra.mxu2 %v2029_v53 }
 0x1b2   :  { %810 = vmatpush.bf16.msra.mxu0 %v1991_v22 }
 0x1b3   :  { %880 = vmatpush.bf16.msra.mxu1 %v1975_v9  ;;  %893 = vmatpush.bf16.msra.mxu2 %v2040_v62 }
 0x1b6   :  { %811 = vmatpush.bf16.msra.mxu0 %v1997_v28 }
 0x1b7   :  { %881 = vmatpush.bf16.msra.mxu1 %v1986_v17  ;;  %894 = vmatpush.bf16.msra.mxu2 %v2052_v8 }
 0x1ba   :  { %812 = vmatpush.bf16.msra.mxu0 %v2003_v34 }
 0x1bb   :  { %882 = vmatpush.bf16.msra.mxu1 %v1994_v25  ;;  %895 = vmatpush.bf16.msra.mxu2 %v2065_v13 }
 0x1be   :  { %813 = vmatpush.bf16.msra.mxu0 %v2018_v47 }
 0x1bf   :  { %883 = vmatpush.bf16.msra.mxu1 %v2000_v29  ;;  %896 = vmatpush.bf16.msra.mxu2 %v2078_v19 }
 0x1c2   :  { %814 = vmatpush.bf16.msra.mxu0 %v2031_v54 }
 0x1c3   :  { %884 = vmatpush.bf16.msra.mxu1 %v2006_v35  ;;  %897 = vmatpush.bf16.msra.mxu2 %v2087_v24 }
 0x1c6   :  { %815 = vmatpush.bf16.msra.mxu0 %v2042_v63 }
 0x1c7   :  { %885 = vmatpush.bf16.msra.mxu1 %v2015_v41  ;;  %898 = vmatpush.bf16.msra.mxu2 %v2093_v30 }
 0x1ca   :  { %816 = vmatpush.bf16.msra.mxu0 %v2048_v6 }
 0x1cb   :  { %886 = vmatpush.bf16.msra.mxu1 %v2025_v50  ;;  %899 = vmatpush.bf16.msra.mxu2 %v2108_v37 }
 0x22a   :  { %v600_v5 = vpop.f32.mrf.mxu0  ;;  %v613_v36 = vpop.f32.mrf.mxu1 }
 0x22b   :  { %v630_v10 = vadd.f32 %v600_v5, %v2170_v44  ;;  %v650_v21 = vadd.f32 %v613_v36, %v185_v31 }
 0x22d   :  { %v1567_v61 = vmul.f32 -1.442695, %v630_v10  ;;  %v1568_v0 = vmul.f32 -1.442695, %v650_v21 }
 0x22f   :  { %1731 = vpow2.f32 %v1567_v61 }
 0x230   :  { %1733 = vpow2.f32 %v1568_v0 }
 0x231   :  { %v626_v11 = vpop.f32.mrf.mxu2 }
 0x232   :  { %v602_v15 = vpop.f32.mrf.mxu0  ;;  %v615_v7 = vpop.f32.mrf.mxu1  ;;  %v670_v0 = vadd.f32 %v2188_v32, %v626_v11 }
 0x235   :  { %v1732_v38 = vpop.eup %1731 }
 0x236   :  { %v1734_v18 = vpop.eup %1733  ;;  %v634_v14 = vadd.f32 1.0, %v1732_v38  ;;  %v214_v38 = vadd.f32 %v2224_v40, %v2191_v48  ;;  %v681_v40 = vpop.permute.xlu1 %680 }
 0x237   :  { %v654_v20 = vadd.f32 1.0, %v1734_v18 }
 0x238   :  { %1735 = vrcp.f32 %v634_v14  ;;  %v646_v42 = vand.u32 2147483648, %v634_v14  ;;  %v644_v5 = vand.u32 2147483647, %v634_v14  ;;  %vm640_vm4 = vweird.f32 %v634_v14 }
 0x239   :  { %1737 = vrcp.f32 %v654_v20  ;;  %v628_v60 = vpop.f32.mrf.mxu2  ;;  %vm660_vm8 = vweird.f32 %v654_v20 }
 0x23a   :  { %v647_v21 = vor.u32 1.1754944e-38, %v646_v42  ;;  %vm645_vm6 = vcmp.eq.f32.partialorder %v644_v5, 8.507059e+37  ;;  %v666_v60 = vand.u32 2147483648, %v654_v20 }
 0x23e   :  { %v1736_v39 = vpop.eup %1735 }
 0x23f   :  { %v1738_v33 = vpop.eup %1737  ;;  %v636_v4 = vmul.f32 %v1736_v39, %v634_v14  ;;  %vm641_vm3 = vweird.f32 %v1736_v39  ;;  %v667_v14 = vor.u32 1.1754944e-38, %v666_v60 }
 0x240   :  { %v656_v23 = vmul.f32 %v1738_v33, %v654_v20  ;;  %vm642_vm5 = vmor %vm640_vm4, %vm641_vm3  ;;  %vm661_vm7 = vweird.f32 %v1738_v33 }
 0x241   :  { %v637_v44 = vsub.f32 1.0, %v636_v4  ;;  %v664_v4 = vand.u32 2147483647, %v654_v20  ;;  %vm662_vm9 = vmor %vm660_vm8, %vm661_vm7 }
 0x242   :  { %v657_v26 = vsub.f32 1.0, %v656_v23 }
 0x243   :  { %v638_v31 = vmul.f32 %v1736_v39, %v637_v44  ;;  %vm665_vm10 = vcmp.eq.f32.partialorder %v664_v4, 8.507059e+37 }
 0x244   :  { %v658_v36 = vmul.f32 %v1738_v33, %v657_v26 }
 0x245   :  { %v639_v10 = vadd.f32 %v1736_v39, %v638_v31 }
 0x246   :  { %v659_v7 = vadd.f32 %v1738_v33, %v658_v36 }
 0x247   :  { %v643_v61 = vsel %vm642_vm5, %v1736_v39, %v639_v10 }
 0x248   :  { %v648_v15 = vsel %vm645_vm6, %v647_v21, %v643_v61  ;;  %v663_v44 = vsel %vm662_vm9, %v1738_v33, %v659_v7 }
 0x249   :  { %v671_v18 = vmul.f32 %v670_v0, %v648_v15  ;;  %v668_v39 = vsel %vm665_vm10, %v667_v14, %v663_v44 }
 0x24a   :  { %v674_v26 = vsub.f32 1.0, %v668_v39  ;;  %v676_v31 = vmul.f32 %v668_v39, %v2268_v27 }
 0x24b   :  { %v672_v23 = vadd.f32 %v671_v18, %v214_v38 }
 0x24d   :  { %1739 = vtanh.f32 %v672_v23 }
 0x253   :  { %v1740_v42 = vpop.eup %1739 }
 0x254   :  { %v675_v11 = vmul.f32 %v1740_v42, %v674_v26 }
 0x256   :  { %v677_v5 = vadd.f32 %v676_v31, %v675_v11 }
 0x258   :  { %v683_v36 = vsub.f32 %v677_v5, %v2268_v27 }
 0x25a   :  { %v684_v10 = vmul.f32 %v683_v36, %v681_v40 }
 0x25c   :  { %v2305_v21 = vadd.f32 %v684_v10, %v2268_v27  ;;  %v187_v27 = vadd.f32 %v2226_v43, %v2180_v2 }
 0x25e   :  { %v686_v20 = vpack.c.bf16 %v2305_v21, %v2305_v21 }
 0x260   :  { %695 = vmatmul.bf16.vlgmr.msrb.gmra.mxu3 %v686_v20  ;;  %708 = vmatmul.bf16.vlgmr.msrb.gmra.mxu0 %v686_v20 }
 0x261   :  { %721 = vmatmul.bf16.vlgmr.msrb.gmra.mxu1 %v686_v20  ;;  %905 = vmatpush.bf16.msrb.mxu3 %v1983_v16 }
 0x262   :  { %975 = vmatpush.bf16.msrb.mxu0 %v1969_v3  ;;  %988 = vmatpush.bf16.msrb.mxu1 %v2029_v53 }
 0x265   :  { %906 = vmatpush.bf16.msrb.mxu3 %v1991_v22 }
 0x266   :  { %976 = vmatpush.bf16.msrb.mxu0 %v1975_v9  ;;  %989 = vmatpush.bf16.msrb.mxu1 %v2040_v62 }
 0x269   :  { %907 = vmatpush.bf16.msrb.mxu3 %v1997_v28 }
 0x26a   :  { %977 = vmatpush.bf16.msrb.mxu0 %v1986_v17  ;;  %990 = vmatpush.bf16.msrb.mxu1 %v2052_v8 }
 0x26d   :  { %908 = vmatpush.bf16.msrb.mxu3 %v2003_v34 }
 0x26e   :  { %978 = vmatpush.bf16.msrb.mxu0 %v1994_v25  ;;  %991 = vmatpush.bf16.msrb.mxu1 %v2065_v13 }
 0x271   :  { %909 = vmatpush.bf16.msrb.mxu3 %v2018_v47 }
 0x272   :  { %979 = vmatpush.bf16.msrb.mxu0 %v2000_v29  ;;  %992 = vmatpush.bf16.msrb.mxu1 %v2078_v19 }
 0x275   :  { %910 = vmatpush.bf16.msrb.mxu3 %v2031_v54 }
 0x276   :  { %980 = vmatpush.bf16.msrb.mxu0 %v2006_v35  ;;  %993 = vmatpush.bf16.msrb.mxu1 %v2087_v24 }
 0x279   :  { %911 = vmatpush.bf16.msrb.mxu3 %v2042_v63 }
 0x27a   :  { %981 = vmatpush.bf16.msrb.mxu0 %v2015_v41  ;;  %994 = vmatpush.bf16.msrb.mxu1 %v2093_v30 }
 0x27d   :  { %912 = vmatpush.bf16.msrb.mxu3 %v2048_v6 }
 0x27e   :  { %982 = vmatpush.bf16.msrb.mxu0 %v2025_v50  ;;  %995 = vmatpush.bf16.msrb.mxu1 %v2108_v37 }
 0x2dd   :  { %v709_v33 = vpop.f32.mrf.mxu0 }
 0x2de   :  { %v746_v61 = vadd.f32 %v709_v33, %v187_v27  ;;  %v722_v0 = vpop.f32.mrf.mxu1 }
 0x2e0   :  { %v1570_v15 = vmul.f32 -1.442695, %v746_v61 }
 0x2e2   :  { %1741 = vpow2.f32 %v1570_v15  ;;  %v766_v15 = vadd.f32 %v2188_v32, %v722_v0 }
 0x2e3   :  { %v696_v7 = vpop.f32.mrf.mxu3 }
 0x2e4   :  { %v726_v38 = vadd.f32 %v696_v7, %v2172_v46  ;;  %v265_v46 = vld [vmem:[%s2483_s1 + $0x20] sm:$0xff] }
 0x2e5   :  { %v711_v18 = vpop.f32.mrf.mxu0  ;;  %872 = vperm.xlu2 %1703, %v265_v46  }
 0x2e6   :  { %v1569_v60 = vmul.f32 -1.442695, %v726_v38  ;;  %v724_v4 = vpop.f32.mrf.mxu1  ;;  %v266_v38 = vld [vmem:[%s2483_s1 + $0x28] sm:$0xff] }
 0x2e7   :  { %v216_v4 = vadd.f32 %v2228_v45, %v2191_v48 }
 0x2e8   :  { %v1742_v23 = vpop.eup %1741  ;;  %1743 = vpow2.f32 %v1569_v60 }
 0x2e9   :  { %v750_v44 = vadd.f32 1.0, %v1742_v23 }
 0x2eb   :  { %v698_v14 = vpop.f32.mrf.mxu3  ;;  %1745 = vrcp.f32 %v750_v44  ;;  %v762_v23 = vand.u32 2147483648, %v750_v44  ;;  %vm756_vm0 = vweird.f32 %v750_v44 }
 0x2ed   :  { %968 = vperm.xlu2 %1703, %v266_v38  }
 0x2ee   :  { %v1744_v39 = vpop.eup %1743 }
 0x2ef   :  { %v730_v26 = vadd.f32 1.0, %v1744_v39  ;;  %v760_v39 = vand.u32 2147483647, %v750_v44 }
 0x2f1   :  { %1747 = vrcp.f32 %v730_v26  ;;  %v1746_v43 = vpop.eup %1745  ;;  %v742_v40 = vand.u32 2147483648, %v730_v26  ;;  %v740_v20 = vand.u32 2147483647, %v730_v26  ;;  %vm736_vm12 = vweird.f32 %v730_v26 }
 0x2f2   :  { %v752_v42 = vmul.f32 %v1746_v43, %v750_v44  ;;  %vm757_vm15 = vweird.f32 %v1746_v43  ;;  %vm761_vm3 = vcmp.eq.f32.partialorder %v760_v39, 8.507059e+37 }
 0x2f3   :  { %v743_v61 = vor.u32 1.1754944e-38, %v742_v40  ;;  %vm741_vm14 = vcmp.eq.f32.partialorder %v740_v20, 8.507059e+37  ;;  %vm758_vm2 = vmor %vm756_vm0, %vm757_vm15 }
 0x2f4   :  { %v753_v5 = vsub.f32 1.0, %v752_v42  ;;  %v763_v42 = vor.u32 1.1754944e-38, %v762_v23 }
 0x2f6   :  { %v754_v27 = vmul.f32 %v1746_v43, %v753_v5 }
 0x2f7   :  { %v1748_v11 = vpop.eup %1747 }
 0x2f8   :  { %v732_v31 = vmul.f32 %v1748_v11, %v730_v26  ;;  %vm737_vm11 = vweird.f32 %v1748_v11  ;;  %v755_v18 = vadd.f32 %v1746_v43, %v754_v27 }
 0x2f9   :  { %vm738_vm13 = vmor %vm736_vm12, %vm737_vm11 }
 0x2fa   :  { %v733_v36 = vsub.f32 1.0, %v732_v31  ;;  %v759_v0 = vsel %vm758_vm2, %v1746_v43, %v755_v18 }
 0x2fc   :  { %v734_v10 = vmul.f32 %v1748_v11, %v733_v36 }
 0x2fe   :  { %v735_v33 = vadd.f32 %v1748_v11, %v734_v10  ;;  %v777_v10 = vpop.permute.xlu1 %776 }
 0x300   :  { %v739_v7 = vsel %vm738_vm13, %v1748_v11, %v735_v33  ;;  %v764_v11 = vsel %vm761_vm3, %v763_v42, %v759_v0 }
 0x301   :  { %v744_v60 = vsel %vm741_vm14, %v743_v61, %v739_v7  ;;  %v770_v31 = vsub.f32 1.0, %v764_v11  ;;  %v772_v36 = vmul.f32 %v764_v11, %v2305_v21 }
 0x302   :  { %v767_v14 = vmul.f32 %v766_v15, %v744_v60 }
 0x304   :  { %v768_v26 = vadd.f32 %v767_v14, %v216_v4 }
 0x306   :  { %1749 = vtanh.f32 %v768_v26  ;;  %v219_v26 = vadd.f32 %v2232_v51, %v2191_v48 }
 0x30c   :  { %v1750_v5 = vpop.eup %1749 }
 0x30d   :  { %v771_v46 = vmul.f32 %v1750_v5, %v770_v31 }
 0x30f   :  { %v773_v40 = vadd.f32 %v772_v36, %v771_v46 }
 0x311   :  { %v779_v45 = vsub.f32 %v773_v40, %v2305_v21 }
 0x313   :  { %v780_v20 = vmul.f32 %v779_v45, %v777_v10 }
 0x315   :  { %v2348_v44 = vadd.f32 %v780_v20, %v2305_v21 }
 0x317   :  { %v782_v43 = vpack.c.bf16 %v2348_v44, %v2348_v44 }
 0x319   :  { %791 = vmatmul.bf16.vlgmr.msrb.gmra.mxu2 %v782_v43  ;;  %804 = vmatmul.bf16.vlgmr.msra.gmra.mxu3 %v782_v43 }
 0x31a   :  { %817 = vmatmul.bf16.vlgmr.msra.gmra.mxu0 %v782_v43  ;;  %1001 = vmatpush.bf16.msrb.mxu2 %v1983_v16 }
 0x31b   :  { %1071 = vmatpush.bf16.msra.mxu3 %v1969_v3  ;;  %1084 = vmatpush.bf16.msra.mxu0 %v2029_v53 }
 0x31e   :  { %1002 = vmatpush.bf16.msrb.mxu2 %v1991_v22 }
 0x31f   :  { %1072 = vmatpush.bf16.msra.mxu3 %v1975_v9  ;;  %1085 = vmatpush.bf16.msra.mxu0 %v2040_v62  ;;  %v190_v9 = vadd.f32 %v2230_v49, %v2180_v2 }
 0x322   :  { %1003 = vmatpush.bf16.msrb.mxu2 %v1997_v28 }
 0x323   :  { %1073 = vmatpush.bf16.msra.mxu3 %v1986_v17  ;;  %1086 = vmatpush.bf16.msra.mxu0 %v2052_v8 }
 0x326   :  { %1004 = vmatpush.bf16.msrb.mxu2 %v2003_v34 }
 0x327   :  { %1074 = vmatpush.bf16.msra.mxu3 %v1994_v25  ;;  %1087 = vmatpush.bf16.msra.mxu0 %v2065_v13 }
 0x32a   :  { %1005 = vmatpush.bf16.msrb.mxu2 %v2018_v47 }
 0x32b   :  { %1075 = vmatpush.bf16.msra.mxu3 %v2000_v29  ;;  %1088 = vmatpush.bf16.msra.mxu0 %v2078_v19 }
 0x32e   :  { %1006 = vmatpush.bf16.msrb.mxu2 %v2031_v54 }
 0x32f   :  { %1076 = vmatpush.bf16.msra.mxu3 %v2006_v35  ;;  %1089 = vmatpush.bf16.msra.mxu0 %v2087_v24 }
 0x332   :  { %1007 = vmatpush.bf16.msrb.mxu2 %v2042_v63 }
 0x333   :  { %1077 = vmatpush.bf16.msra.mxu3 %v2015_v41  ;;  %1090 = vmatpush.bf16.msra.mxu0 %v2093_v30 }
 0x336   :  { %1008 = vmatpush.bf16.msrb.mxu2 %v2048_v6 }
 0x337   :  { %1078 = vmatpush.bf16.msra.mxu3 %v2025_v50  ;;  %1091 = vmatpush.bf16.msra.mxu0 %v2108_v37 }
 0x33f   :  { %v873_v51 = vpop.permute.xlu2 %872 }
 0x397   :  { %v818_v3 = vpop.f32.mrf.mxu0 }
 0x398   :  { %v862_v4 = vadd.f32 %v2188_v32, %v818_v3 }
 0x39c   :  { %v792_v17 = vpop.f32.mrf.mxu2  ;;  %v805_v25 = vpop.f32.mrf.mxu3 }
 0x39d   :  { %v822_v29 = vadd.f32 %v792_v17, %v2174_v55  ;;  %v842_v35 = vadd.f32 %v805_v25, %v190_v9 }
 0x39f   :  { %v1571_v53 = vmul.f32 -1.442695, %v822_v29  ;;  %v1572_v62 = vmul.f32 -1.442695, %v842_v35  ;;  %v820_v41 = vpop.f32.mrf.mxu0 }
 0x3a1   :  { %1751 = vpow2.f32 %v1571_v53 }
 0x3a2   :  { %1753 = vpow2.f32 %v1572_v62 }
 0x3a4   :  { %v794_v8 = vpop.f32.mrf.mxu2  ;;  %v807_v13 = vpop.f32.mrf.mxu3 }
 0x3a7   :  { %v1752_v19 = vpop.eup %1751 }
 0x3a8   :  { %v1754_v50 = vpop.eup %1753  ;;  %v826_v24 = vadd.f32 1.0, %v1752_v19 }
 0x3a9   :  { %v846_v30 = vadd.f32 1.0, %v1754_v50 }
 0x3aa   :  { %1755 = vrcp.f32 %v826_v24  ;;  %v838_v55 = vand.u32 2147483648, %v826_v24  ;;  %v836_v7 = vand.u32 2147483647, %v826_v24  ;;  %vm832_vm5 = vweird.f32 %v826_v24 }
 0x3ab   :  { %1757 = vrcp.f32 %v846_v30  ;;  %v858_v0 = vand.u32 2147483648, %v846_v30  ;;  %vm852_vm9 = vweird.f32 %v846_v30  ;;  %v856_v11 = vand.u32 2147483647, %v846_v30 }
 0x3ac   :  { %v839_v60 = vor.u32 1.1754944e-38, %v838_v55  ;;  %vm837_vm7 = vcmp.eq.f32.partialorder %v836_v7, 8.507059e+37 }
 0x3ad   :  { %v859_v36 = vor.u32 1.1754944e-38, %v858_v0  ;;  %vm857_vm11 = vcmp.eq.f32.partialorder %v856_v11, 8.507059e+37 }
 0x3b0   :  { %v1756_v37 = vpop.eup %1755 }
 0x3b1   :  { %v1758_v49 = vpop.eup %1757  ;;  %v828_v21 = vmul.f32 %v1756_v37, %v826_v24  ;;  %vm833_vm4 = vweird.f32 %v1756_v37 }
 0x3b2   :  { %v848_v27 = vmul.f32 %v1758_v49, %v846_v30  ;;  %vm834_vm6 = vmor %vm832_vm5, %vm833_vm4  ;;  %vm853_vm8 = vweird.f32 %v1758_v49 }
 0x3b3   :  { %v829_v33 = vsub.f32 1.0, %v828_v21  ;;  %vm854_vm10 = vmor %vm852_vm9, %vm853_vm8 }
 0x3b4   :  { %v849_v61 = vsub.f32 1.0, %v848_v27 }
 0x3b5   :  { %v830_v15 = vmul.f32 %v1756_v37, %v829_v33 }
 0x3b6   :  { %v850_v38 = vmul.f32 %v1758_v49, %v849_v61  ;;  %v221_v61 = vadd.f32 %v2236_v56, %v2191_v48 }
 0x3b7   :  { %v831_v18 = vadd.f32 %v1756_v37, %v830_v15 }
 0x3b8   :  { %v851_v39 = vadd.f32 %v1758_v49, %v850_v38 }
 0x3b9   :  { %v835_v23 = vsel %vm834_vm6, %v1756_v37, %v831_v18 }
 0x3ba   :  { %v840_v14 = vsel %vm837_vm7, %v839_v60, %v835_v23  ;;  %v855_v5 = vsel %vm854_vm10, %v1758_v49, %v851_v39 }
 0x3bb   :  { %v863_v42 = vmul.f32 %v862_v4, %v840_v14  ;;  %v860_v46 = vsel %vm857_vm11, %v859_v36, %v855_v5  ;;  %v969_v5 = vpop.permute.xlu2 %968 }
 0x3bc   :  { %v866_v40 = vsub.f32 1.0, %v860_v46  ;;  %v868_v20 = vmul.f32 %v860_v46, %v2348_v44 }
 0x3bd   :  { %v864_v31 = vadd.f32 %v863_v42, %v219_v26 }
 0x3bf   :  { %1759 = vtanh.f32 %v864_v31 }
 0x3c5   :  { %v1760_v45 = vpop.eup %1759 }
 0x3c6   :  { %v867_v10 = vmul.f32 %v1760_v45, %v866_v40  ;;  %v195_v45 = vadd.f32 %v2238_v57, %v2180_v2 }
 0x3c8   :  { %v869_v43 = vadd.f32 %v868_v20, %v867_v10 }
 0x3ca   :  { %v875_v3 = vsub.f32 %v869_v43, %v2348_v44 }
 0x3cc   :  { %v876_v9 = vmul.f32 %v875_v3, %v873_v51 }
 0x3ce   :  { %v2385_v17 = vadd.f32 %v876_v9, %v2348_v44 }
 0x3d0   :  { %v878_v25 = vpack.c.bf16 %v2385_v17, %v2385_v17 }
 0x3d2   :  { %887 = vmatmul.bf16.vlgmr.msra.gmra.mxu1 %v878_v25  ;;  %900 = vmatmul.bf16.vlgmr.msra.gmra.mxu2 %v878_v25 }
 0x3d3   :  { %913 = vmatmul.bf16.vlgmr.msrb.gmra.mxu3 %v878_v25  ;;  %1097 = vmatpush.bf16.msra.mxu1 %v1983_v16  ;;  %v192_v16 = vadd.f32 %v2234_v52, %v2180_v2 }
 0x3d7   :  { %1098 = vmatpush.bf16.msra.mxu1 %v1991_v22 }
 0x3db   :  { %1099 = vmatpush.bf16.msra.mxu1 %v1997_v28 }
 0x3df   :  { %1100 = vmatpush.bf16.msra.mxu1 %v2003_v34 }
 0x3e3   :  { %1101 = vmatpush.bf16.msra.mxu1 %v2018_v47 }
 0x3e7   :  { %1102 = vmatpush.bf16.msra.mxu1 %v2031_v54 }
 0x3eb   :  { %1103 = vmatpush.bf16.msra.mxu1 %v2042_v63 }
 0x3ef   :  { %1104 = vmatpush.bf16.msra.mxu1 %v2048_v6 }
 0x44f   :  { %v888_v44 = vpop.f32.mrf.mxu1 }
 0x450   :  { %v918_v29 = vadd.f32 %v888_v44, %v2176_v59 }
 0x452   :  { %v1573_v35 = vmul.f32 -1.442695, %v918_v29 }
 0x454   :  { %1761 = vpow2.f32 %v1573_v35 }
 0x455   :  { %v901_v22 = vpop.f32.mrf.mxu2 }
 0x456   :  { %v938_v28 = vadd.f32 %v901_v22, %v192_v16  ;;  %v914_v53 = vpop.f32.mrf.mxu3 }
 0x457   :  { %v890_v34 = vpop.f32.mrf.mxu1  ;;  %v958_v55 = vadd.f32 %v2188_v32, %v914_v53 }
 0x458   :  { %v1574_v62 = vmul.f32 -1.442695, %v938_v28 }
 0x45a   :  { %v1762_v47 = vpop.eup %1761  ;;  %1763 = vpow2.f32 %v1574_v62 }
 0x45b   :  { %v922_v54 = vadd.f32 1.0, %v1762_v47 }
 0x45d   :  { %1765 = vrcp.f32 %v922_v54  ;;  %v903_v63 = vpop.f32.mrf.mxu2  ;;  %v934_v50 = vand.u32 2147483648, %v922_v54  ;;  %v932_v24 = vand.u32 2147483647, %v922_v54  ;;  %vm928_vm13 = vweird.f32 %v922_v54 }
 0x45e   :  { %v916_v41 = vpop.f32.mrf.mxu3 }
 0x45f   :  { %v935_v21 = vor.u32 1.1754944e-38, %v934_v50  ;;  %vm933_vm15 = vcmp.eq.f32.partialorder %v932_v24, 8.507059e+37 }
 0x460   :  { %v1764_v6 = vpop.eup %1763 }
 0x461   :  { %v942_v8 = vadd.f32 1.0, %v1764_v6 }
 0x463   :  { %v1766_v13 = vpop.eup %1765  ;;  %1767 = vrcp.f32 %v942_v8  ;;  %v954_v38 = vand.u32 2147483648, %v942_v8  ;;  %v952_v60 = vand.u32 2147483647, %v942_v8  ;;  %vm948_vm2 = vweird.f32 %v942_v8 }
 0x464   :  { %v924_v59 = vmul.f32 %v1766_v13, %v922_v54  ;;  %vm929_vm12 = vweird.f32 %v1766_v13 }
 0x465   :  { %vm930_vm14 = vmor %vm928_vm13, %vm929_vm12  ;;  %v955_v14 = vor.u32 1.1754944e-38, %v954_v38  ;;  %vm953_vm4 = vcmp.eq.f32.partialorder %v952_v60, 8.507059e+37 }
 0x466   :  { %v925_v19 = vsub.f32 1.0, %v924_v59 }
 0x468   :  { %v926_v52 = vmul.f32 %v1766_v13, %v925_v19  ;;  %v2416_v19 = vld [vmem:[%s2487_s5] ss:$0 sm:$0xff] }
 0x469   :  { %v1768_v30 = vpop.eup %1767 }
 0x46a   :  { %v944_v37 = vmul.f32 %v1768_v30, %v942_v8  ;;  %v927_v49 = vadd.f32 %v1766_v13, %v926_v52  ;;  %vm949_vm0 = vweird.f32 %v1768_v30 }
 0x46b   :  { %vm950_vm3 = vmor %vm948_vm2, %vm949_vm0 }
 0x46c   :  { %v945_v27 = vsub.f32 1.0, %v944_v37  ;;  %v931_v33 = vsel %vm930_vm14, %v1766_v13, %v927_v49 }
 0x46d   :  { %v936_v15 = vsel %vm933_vm15, %v935_v21, %v931_v33 }
 0x46e   :  { %v946_v7 = vmul.f32 %v1768_v30, %v945_v27  ;;  %v959_v18 = vmul.f32 %v958_v55, %v936_v15 }
 0x470   :  { %v947_v4 = vadd.f32 %v1768_v30, %v946_v7  ;;  %v960_v23 = vadd.f32 %v959_v18, %v221_v61 }
 0x472   :  { %v951_v39 = vsel %vm950_vm3, %v1768_v30, %v947_v4  ;;  %1769 = vtanh.f32 %v960_v23  ;;  %v224_v30 = vadd.f32 %v2240_v58, %v2191_v48  ;;  %v1065_v58 = vpop.permute.xlu0 %1064 }
 0x473   :  { %v956_v26 = vsel %vm953_vm4, %v955_v14, %v951_v39 }
 0x474   :  { %v962_v0 = vsub.f32 1.0, %v956_v26  ;;  %v964_v56 = vmul.f32 %v956_v26, %v2385_v17  ;;  %v1678_v26 = vld [vmem:[%s2488_s6 + $0x38] sm:$0xff] }
 0x475   :  { %1235 = vmatpush.bf16.msra.mxu2 %v1678_v26  ;;  %v1161_v26 = vpop.permute.xlu1 %1160 }
 0x478   :  { %v1770_v32 = vpop.eup %1769 }
 0x479   :  { %v963_v42 = vmul.f32 %v1770_v32, %v962_v0  ;;  %v2497_v0 = vld [vmem:[#allocation12_spill] sm:$0xff] }
 0x47a   :  { %v197_v32 = vadd.f32 %v2497_v0, %v2180_v2  ;;  %v1675_v2 = vld [vmem:[%s2488_s6 + $0x20] sm:$0xff] }
 0x47b   :  { %v965_v11 = vadd.f32 %v964_v56, %v963_v42  ;;  %v1677_v56 = vld [vmem:[%s2488_s6 + $0x30] sm:$0xff] }
 0x47c   :  { %1236 = vmatpush.bf16.msra.mxu2 %v1677_v56  ;;  %v1680_v56 = vld [vmem:[#allocation5 + $0x8] sm:$0xff] }
 0x47d   :  { %v971_v31 = vsub.f32 %v965_v11, %v2385_v17 }
 0x47f   :  { %v972_v36 = vmul.f32 %v971_v31, %v969_v5 }
 0x481   :  { %v2406_v46 = vadd.f32 %v972_v36, %v2385_v17  ;;  %v1676_v36 = vld [vmem:[%s2488_s6 + $0x28] sm:$0xff] }
 0x482   :  { %1237 = vmatpush.bf16.msra.mxu2 %v1676_v36 }
 0x483   :  { %v974_v40 = vpack.c.bf16 %v2406_v46, %v2406_v46 }
 0x485   :  { %983 = vmatmul.bf16.vlgmr.msrb.gmra.mxu0 %v974_v40  ;;  %996 = vmatmul.bf16.vlgmr.msrb.gmra.mxu1 %v974_v40 }
 0x486   :  { %1009 = vmatmul.bf16.vlgmr.msrb.gmra.mxu2 %v974_v40  ;;  %v2498_v40 = vld [vmem:[#allocation11_spill] sm:$0xff] }
 0x487   :  { %1238 = vmatpush.bf16.msra.mxu2 %v1675_v2 }
 0x502   :  { %v984_v10 = vpop.f32.mrf.mxu0  ;;  %v997_v20 = vpop.f32.mrf.mxu1 }
 0x503   :  { %v1014_v43 = vadd.f32 %v984_v10, %v2178_v1  ;;  %v1034_v3 = vadd.f32 %v997_v20, %v195_v45 }
 0x505   :  { %v1575_v51 = vmul.f32 -1.442695, %v1014_v43  ;;  %v1576_v9 = vmul.f32 -1.442695, %v1034_v3  ;;  %v1674_v3 = vld [vmem:[%s2488_s6 + $0x18] sm:$0xff] }
 0x506   :  { %1239 = vmatpush.bf16.msra.mxu2 %v1674_v3 }
 0x507   :  { %1771 = vpow2.f32 %v1575_v51 }
 0x508   :  { %1773 = vpow2.f32 %v1576_v9 }
 0x509   :  { %v1010_v17 = vpop.f32.mrf.mxu2 }
 0x50a   :  { %v986_v25 = vpop.f32.mrf.mxu0  ;;  %v999_v44 = vpop.f32.mrf.mxu1  ;;  %v1054_v50 = vadd.f32 %v2416_v19, %v1010_v17 }
 0x50b   :  { %v1673_v25 = vld [vmem:[%s2488_s6 + $0x10] sm:$0xff] }
 0x50c   :  { %1240 = vmatpush.bf16.msra.mxu2 %v1673_v25 }
 0x50d   :  { %v1772_v29 = vpop.eup %1771 }
 0x50e   :  { %v1774_v35 = vpop.eup %1773  ;;  %v1018_v16 = vadd.f32 1.0, %v1772_v29 }
 0x50f   :  { %v1038_v22 = vadd.f32 1.0, %v1774_v35  ;;  %v1672_v35 = vld [vmem:[%s2488_s6 + $0x8] sm:$0xff] }
 0x510   :  { %1775 = vrcp.f32 %v1018_v16  ;;  %v1030_v54 = vand.u32 2147483648, %v1018_v16  ;;  %v1028_v41 = vand.u32 2147483647, %v1018_v16  ;;  %vm1024_vm6 = vweird.f32 %v1018_v16  ;;  %1241 = vmatpush.bf16.msra.mxu2 %v1672_v35 }
 0x511   :  { %1777 = vrcp.f32 %v1038_v22  ;;  %v1012_v28 = vpop.f32.mrf.mxu2  ;;  %v1050_v37 = vand.u32 2147483648, %v1038_v22  ;;  %vm1044_vm10 = vweird.f32 %v1038_v22  ;;  %v1048_v21 = vand.u32 2147483647, %v1038_v22 }
 0x512   :  { %v1031_v13 = vor.u32 1.1754944e-38, %v1030_v54  ;;  %vm1029_vm8 = vcmp.eq.f32.partialorder %v1028_v41, 8.507059e+37  ;;  %v1685_v54 = vld [vmem:[#allocation5 + $0x30] sm:$0xff] }
 0x513   :  { %v1051_v55 = vor.u32 1.1754944e-38, %v1050_v37  ;;  %vm1049_vm12 = vcmp.eq.f32.partialorder %v1048_v21, 8.507059e+37  ;;  %v2499_v37 = vld [vmem:[#allocation13_spill] sm:$0xff] }
 0x516   :  { %v1776_v57 = vpop.eup %1775 }
 0x517   :  { %v1778_v53 = vpop.eup %1777  ;;  %v1020_v34 = vmul.f32 %v1776_v57, %v1018_v16  ;;  %vm1025_vm5 = vweird.f32 %v1776_v57 }
 0x518   :  { %v1040_v62 = vmul.f32 %v1778_v53, %v1038_v22  ;;  %vm1026_vm7 = vmor %vm1024_vm6, %vm1025_vm5  ;;  %vm1045_vm9 = vweird.f32 %v1778_v53  ;;  %v1671_v22 = vld [vmem:[%s2488_s6] sm:$0xff]  ;;  %vm1350_vm6 = vcmask 130112  }
 0x519   :  { %v1021_v1 = vsub.f32 1.0, %v1020_v34  ;;  %vm1046_vm11 = vmor %vm1044_vm10, %vm1045_vm9  ;;  %1242 = vmatpush.bf16.msra.mxu2 %v1671_v22  ;;  %vm1414_vm9 = vcmask 130048   ;;  %vm1416_vm10 = vcmask 195584  }
 0x51a   :  { %v1041_v47 = vsub.f32 1.0, %v1040_v62  ;;  %v1686_v62 = vld [vmem:[#allocation5 + $0x38] sm:$0xff] }
 0x51b   :  { %v1022_v63 = vmul.f32 %v1776_v57, %v1021_v1  ;;  %1318 = vmatpush.bf16.msrb.mxu3 %v1686_v62 }
 0x51c   :  { %v1042_v6 = vmul.f32 %v1778_v53, %v1041_v47 }
 0x51d   :  { %v1023_v8 = vadd.f32 %v1776_v57, %v1022_v63 }
 0x51e   :  { %v1043_v52 = vadd.f32 %v1778_v53, %v1042_v6 }
 0x51f   :  { %v1027_v59 = vsel %vm1026_vm7, %v1776_v57, %v1023_v8  ;;  %1319 = vmatpush.bf16.msrb.mxu3 %v1685_v54  ;;  %vm1371_vm7 = vcmask 195712  }
 0x520   :  { %v1032_v24 = vsel %vm1029_vm8, %v1031_v13, %v1027_v59  ;;  %v1047_v33 = vsel %vm1046_vm11, %v1778_v53, %v1043_v52  ;;  %v1684_v59 = vld [vmem:[#allocation5 + $0x28] sm:$0xff]  ;;  %vm1392_vm8 = vcmask 261312   ;;  %vm1418_vm11 = vcmask 261120  }
 0x521   :  { %v1055_v49 = vmul.f32 %v1054_v50, %v1032_v24  ;;  %v1052_v61 = vsel %vm1049_vm12, %v1051_v55, %v1047_v33  ;;  %v1683_v55 = vld [vmem:[#allocation5 + $0x20] sm:$0xff] }
 0x522   :  { %v1058_v15 = vsub.f32 1.0, %v1052_v61  ;;  %v1060_v18 = vmul.f32 %v1052_v61, %v2406_v46 }
 0x523   :  { %v1056_v27 = vadd.f32 %v1055_v49, %v224_v30  ;;  %v226_v49 = vadd.f32 %v2499_v37, %v2191_v48  ;;  %1320 = vmatpush.bf16.msrb.mxu3 %v1684_v59 }
 0x525   :  { %1779 = vtanh.f32 %v1056_v27 }
 0x527   :  { %1321 = vmatpush.bf16.msrb.mxu3 %v1683_v55 }
 0x52b   :  { %v1780_v7 = vpop.eup %1779 }
 0x52c   :  { %v1059_v38 = vmul.f32 %v1780_v7, %v1058_v15 }
 0x52e   :  { %v1061_v60 = vadd.f32 %v1060_v18, %v1059_v38 }
 0x530   :  { %v1067_v4 = vsub.f32 %v1061_v60, %v2406_v46  ;;  %v1681_v60 = vld [vmem:[#allocation5 + $0x10] sm:$0xff] }
 0x532   :  { %v1068_v23 = vmul.f32 %v1067_v4, %v1065_v58 }
 0x534   :  { %v2424_v14 = vadd.f32 %v1068_v23, %v2406_v46 }
 0x536   :  { %v1070_v39 = vpack.c.bf16 %v2424_v14, %v2424_v14 }
 0x538   :  { %1079 = vmatmul.bf16.vlgmr.msra.gmra.mxu3 %v1070_v39  ;;  %1092 = vmatmul.bf16.vlgmr.msra.gmra.mxu0 %v1070_v39 }
 0x539   :  { %1105 = vmatmul.bf16.vlgmr.msra.gmra.mxu1 %v1070_v39 }
 0x5b5   :  { %v1093_v42 = vpop.f32.mrf.mxu0 }
 0x5b6   :  { %v1130_v11 = vadd.f32 %v1093_v42, %v197_v32  ;;  %v1106_v31 = vpop.f32.mrf.mxu1 }
 0x5b7   :  { %v1150_v50 = vadd.f32 %v2416_v19, %v1106_v31  ;;  %v1682_v19 = vld [vmem:[#allocation5 + $0x18] sm:$0xff]  ;;  %v1709_v31 = vld [vmem:[%s2489_s7] ss:$0 sm:$0xff]  ;;  %s1893_s7 = smov 120  }
 0x5b8   :  { %v1578_v5 = vmul.f32 -1.442695, %v1130_v11  ;;  %1322 = vmatpush.bf16.msrb.mxu3 %v1682_v19  ;;  %v1679_v11 = vld [vmem:[#allocation5] sm:$0xff] }
 0x5ba   :  { %1781 = vpow2.f32 %v1578_v5 }
 0x5bb   :  { %v1080_v46 = vpop.f32.mrf.mxu3 }
 0x5bc   :  { %v1110_v45 = vadd.f32 %v1080_v46, %v2498_v40  ;;  %1323 = vmatpush.bf16.msrb.mxu3 %v1681_v60 }
 0x5bd   :  { %v1095_v10 = vpop.f32.mrf.mxu0 }
 0x5be   :  { %v1577_v20 = vmul.f32 -1.442695, %v1110_v45  ;;  %v1108_v43 = vpop.f32.mrf.mxu1 }
 0x5c0   :  { %v1782_v51 = vpop.eup %1781  ;;  %1783 = vpow2.f32 %v1577_v20  ;;  %1324 = vmatpush.bf16.msrb.mxu3 %v1680_v56 }
 0x5c1   :  { %v1134_v9 = vadd.f32 1.0, %v1782_v51 }
 0x5c3   :  { %v1082_v17 = vpop.f32.mrf.mxu3  ;;  %1785 = vrcp.f32 %v1134_v9  ;;  %v1146_v21 = vand.u32 2147483648, %v1134_v9  ;;  %vm1140_vm3 = vweird.f32 %v1134_v9  ;;  %v1144_v33 = vand.u32 2147483647, %v1134_v9 }
 0x5c4   :  { %1325 = vmatpush.bf16.msrb.mxu3 %v1679_v11  ;;  %v2468_v17 = vpop.permute.xlu1 %1346 }
 0x5c5   :  { %v1147_v7 = vor.u32 1.1754944e-38, %v1146_v21  ;;  %vm1145_vm5 = vcmp.eq.f32.partialorder %v1144_v33, 8.507059e+37 }
 0x5c6   :  { %v1784_v44 = vpop.eup %1783 }
 0x5c7   :  { %v1114_v29 = vadd.f32 1.0, %v1784_v44 }
 0x5c9   :  { %1787 = vrcp.f32 %v1114_v29  ;;  %v1786_v16 = vpop.eup %1785  ;;  %v1126_v47 = vand.u32 2147483648, %v1114_v29  ;;  %v1124_v41 = vand.u32 2147483647, %v1114_v29  ;;  %vm1120_vm14 = vweird.f32 %v1114_v29 }
 0x5ca   :  { %v1136_v28 = vmul.f32 %v1786_v16, %v1134_v9  ;;  %vm1141_vm2 = vweird.f32 %v1786_v16 }
 0x5cb   :  { %v1127_v13 = vor.u32 1.1754944e-38, %v1126_v47  ;;  %vm1125_vm0 = vcmp.eq.f32.partialorder %v1124_v41, 8.507059e+37  ;;  %vm1142_vm4 = vmor %vm1140_vm3, %vm1141_vm2 }
 0x5cc   :  { %v1137_v34 = vsub.f32 1.0, %v1136_v28 }
 0x5ce   :  { %v1138_v6 = vmul.f32 %v1786_v16, %v1137_v34 }
 0x5cf   :  { %v1788_v57 = vpop.eup %1787 }
 0x5d0   :  { %v1116_v53 = vmul.f32 %v1788_v57, %v1114_v29  ;;  %vm1121_vm13 = vweird.f32 %v1788_v57  ;;  %v1139_v24 = vadd.f32 %v1786_v16, %v1138_v6 }
 0x5d1   :  { %vm1122_vm15 = vmor %vm1120_vm14, %vm1121_vm13 }
 0x5d2   :  { %v1117_v1 = vsub.f32 1.0, %v1116_v53  ;;  %v1143_v15 = vsel %vm1142_vm4, %v1786_v16, %v1139_v24 }
 0x5d3   :  { %v1148_v38 = vsel %vm1145_vm5, %v1147_v7, %v1143_v15 }
 0x5d4   :  { %v1118_v63 = vmul.f32 %v1788_v57, %v1117_v1  ;;  %v1154_v18 = vsub.f32 1.0, %v1148_v38  ;;  %v1156_v58 = vmul.f32 %v1148_v38, %v2424_v14 }
 0x5d6   :  { %v1119_v8 = vadd.f32 %v1788_v57, %v1118_v63 }
 0x5d8   :  { %v1123_v52 = vsel %vm1122_vm15, %v1788_v57, %v1119_v8  ;;  %v1896_v8 = vmov 1  }
 0x5d9   :  { %v1128_v30 = vsel %vm1125_vm0, %v1127_v13, %v1123_v52  ;;  %1704 = vset.pattern.permute.xlu1 %v1896_v8  ;;  %v1897_v13 = vmov 2   ;;  %v1898_v52 = vmov 3  }
 0x5da   :  { %v1151_v27 = vmul.f32 %v1150_v50, %v1128_v30  ;;  %1707 = vset.pattern.permute.xlu0 %v1898_v52 }
 0x5dc   :  { %v1152_v61 = vadd.f32 %v1151_v27, %v226_v49 }
 0x5de   :  { %1789 = vtanh.f32 %v1152_v61 }
 0x5e4   :  { %v1790_v4 = vpop.eup %1789 }
 0x5e5   :  { %v1155_v48 = vmul.f32 %v1790_v4, %v1154_v18 }
 0x5e7   :  { %v1157_v23 = vadd.f32 %v1156_v58, %v1155_v48 }
 0x5e9   :  { %v1163_v39 = vsub.f32 %v1157_v23, %v2424_v14 }
 0x5eb   :  { %v1164_v0 = vmul.f32 %v1163_v39, %v1161_v26 }
 0x5ed   :  { %v1165_v32 = vadd.f32 %v1164_v0, %v2424_v14  ;;  %v1710_v14 = vld [vmem:[%s2491_s9] ss:$0 sm:$0xff]  ;;  %s1894_s9 = smov 112  }
 0x5ef   :  { %v1166_v42 = vpack.c.bf16 %v1165_v32, %v1165_v32 }
 0x5f1   :  { %1243 = vmatmul.bf16.vlgmr.msra.gmra.mxu2 %v1166_v42 }
 0x674   :  { %v1244_v5 = vpop.f32.mrf.mxu2 }
 0x675   :  { %v1245_v36 = vadd.f32 %v1709_v31, %v1244_v5 }
 0x677   :  { %v1248_v46 = vmax.f32 %v1245_v36, 0.0 }
 0x679   :  { %v1249_v40 = vpack.c.bf16 %v1248_v46, %v1248_v46 }
 0x67b   :  { %1326 = vmatmul.bf16.vlgmr.msrb.gmra.mxu3 %v1249_v40 }
 0x67c   :  { %v1246_v45 = vpop.f32.mrf.mxu2 }
 0x6fe   :  { %v1327_v10 = vpop.f32.mrf.mxu3 }
 0x6ff   :  { %v1328_v2 = vadd.f32 %v1710_v14, %v1327_v10 }
 0x701   :  { %v1351_v20 = vsel %vm1350_vm6, %v1328_v2, -inf  ;;  %v1333_v43 = vsel %vm118_vm1, %v1328_v2, -inf  ;;  %v1372_v51 = vsel %vm1371_vm7, %v1328_v2, -inf  ;;  %v1393_v9 = vsel %vm1392_vm8, %v1328_v2, -inf }
 0x702   :  { %1352 = vmax.xlane.f32.xlu1 %v1351_v20  ;;  %1334 = vmax.xlane.f32.xlu2 %v1333_v43 }
 0x706   :  { %v1329_v3 = vpop.f32.mrf.mxu3 }
 0x70a   :  { %1373 = vmax.xlane.f32.xlu2 %v1372_v51 }
 0x712   :  { %1394 = vmax.xlane.f32.xlu2 %v1393_v9 }
 0x71b   :  { %1367 = vperm.xlu1 %1704, %v2263_v12  }
 0x723   :  { %1705 = vset.pattern.permute.xlu1 %v1897_v13 }
 0x724   :  { %1388 = vperm.xlu1 %1705, %v2263_v12  }
 0x72c   :  { %1706 = vset.pattern.permute.xlu1 %v1898_v52 }
 0x72d   :  { %1409 = vperm.xlu1 %1706, %v2263_v12  }
 0x775   :  { %v1353_v25 = vpop.xlane.xlu1 %1352  ;;  %v1335_v44 = vpop.xlane.xlu2 %1334 }
 0x776   :  { %v1354_v29 = vsub.f32 %v1328_v2, %v1353_v25  ;;  %v1336_v54 = vsub.f32 %v1328_v2, %v1335_v44 }
 0x778   :  { %v1355_v35 = vmul.f32 1.442695, %v1354_v29  ;;  %v1337_v63 = vmul.f32 1.442695, %v1336_v54 }
 0x77a   :  { %1791 = vpow2.f32 %v1355_v35 }
 0x77d   :  { %v1374_v16 = vpop.xlane.xlu2 %1373 }
 0x77e   :  { %v1375_v22 = vsub.f32 %v1328_v2, %v1374_v16 }
 0x780   :  { %v1792_v28 = vpop.eup %1791  ;;  %v1376_v57 = vmul.f32 1.442695, %v1375_v22 }
 0x781   :  { %1358 = vrot.lane.b32.xlu0 %v1792_v28, %s1893_s7 }
 0x782   :  { %1793 = vpow2.f32 %v1376_v57 }
 0x785   :  { %v1395_v53 = vpop.xlane.xlu2 %1394 }
 0x786   :  { %v1396_v34 = vsub.f32 %v1328_v2, %v1395_v53 }
 0x788   :  { %v1794_v62 = vpop.eup %1793  ;;  %v1397_v1 = vmul.f32 1.442695, %v1396_v34 }
 0x789   :  { %1379 = vrot.lane.b32.xlu2 %v1794_v62, %s1894_s9 }
 0x78a   :  { %1795 = vpow2.f32 %v1397_v1 }
 0x78b   :  { %1797 = vpow2.f32 %v1337_v63 }
 0x78d   :  { %v1368_v33 = vpop.permute.xlu1 %1367 }
 0x790   :  { %v1796_v47 = vpop.eup %1795 }
 0x791   :  { %1400 = vrot.lane.b32.xlu0 %v1796_v47, %s1895_s14  ;;  %v1798_v41 = vpop.eup %1797 }
 0x792   :  { %v1339_v6 = vsel %vm118_vm1, %v1798_v41, 0.0 }
 0x796   :  { %v1389_v7 = vpop.permute.xlu1 %1388 }
 0x79f   :  { %v1410_v23 = vpop.permute.xlu1 %1409 }
 0x7bb   :  { %1340 = vadd.xlane.f32.xlu0 %v1339_v6 }
 0x7e3   :  { %v1380_v59 = vpop.permute.xlu2 %1379 }
 0x7e4   :  { %v1382_v50 = vsel %vm118_vm1, %v1380_v59, 0.0 }
 0x7e5   :  { %1383 = vadd.xlane.f32.xlu0 %v1382_v50 }
 0x7f3   :  { %v1359_v24 = vpop.permute.xlu0 %1358 }
 0x7f4   :  { %v1361_v30 = vsel %vm118_vm1, %v1359_v24, 0.0 }
 0x7f5   :  { %1362 = vadd.xlane.f32.xlu2 %v1361_v30 }
 0x803   :  { %v1401_v37 = vpop.permute.xlu0 %1400 }
 0x804   :  { %v1403_v49 = vsel %vm118_vm1, %v1401_v37, 0.0 }
 0x805   :  { %1404 = vadd.xlane.f32.xlu2 %v1403_v49 }
 0x82e   :  { %v1341_v21 = vpop.xlane.xlu0 %1340 }
 0x858   :  { %v1384_v55 = vpop.xlane.xlu0 %1383 }
 0x868   :  { %v1363_v27 = vpop.xlane.xlu2 %1362 }
 0x869   :  { %1799 = vrcp.f32 %v1363_v27 }
 0x86a   :  { %1801 = vrcp.f32 %v1341_v21 }
 0x86b   :  { %1803 = vrcp.f32 %v1384_v55 }
 0x86f   :  { %v1800_v61 = vpop.eup %1799 }
 0x870   :  { %v1802_v15 = vpop.eup %1801  ;;  %v1365_v19 = vmul.f32 %v1800_v61, %v1792_v28 }
 0x871   :  { %v1804_v38 = vpop.eup %1803  ;;  %v1343_v18 = vmul.f32 %v1802_v15, %v1798_v41 }
 0x872   :  { %v1370_v60 = vmul.f32 %v1368_v33, %v1365_v19  ;;  %v1386_v4 = vmul.f32 %v1804_v38, %v1794_v62 }
 0x873   :  { %v1349_v48 = vmul.f32 %v2468_v17, %v1343_v18 }
 0x874   :  { %v1391_v0 = vmul.f32 %v1389_v7, %v1386_v4 }
 0x875   :  { %v1413_v26 = vsel %vm118_vm1, %v1349_v48, %v1370_v60 }
 0x876   :  { %v1415_v42 = vsel %vm1414_vm9, %v1413_v26, %v1391_v0 }
 0x878   :  { %v1405_v12 = vpop.xlane.xlu2 %1404 }
 0x879   :  { %1805 = vrcp.f32 %v1405_v12 }
 0x87f   :  { %v1806_v58 = vpop.eup %1805 }
 0x880   :  { %v1407_v39 = vmul.f32 %v1806_v58, %v1796_v47 }
 0x882   :  { %v1412_v32 = vmul.f32 %v1410_v23, %v1407_v39 }
 0x884   :  { %v1417_v56 = vsel %vm1416_vm10, %v1415_v42, %v1412_v32 }
 0x885   :  { %v1419_v11 = vsel %vm1418_vm11, %v1417_v56, 0.0 }
 0x886   :  { %1420 = vst [vmem:[#allocation7] sm:$0xff] %v1419_v11 }
 0x887   :  { %1431 = dma.vmem_to_hbm [thread:$0]  %s1427_s10, 128, %s1429_s2, [#allocation4]  }
 0x888   :  { %1884 = dma.done.wait [#allocation4], 128  }
 0x889   :  { %1885 = vsyncadd [#allocation4], 4294967168 }
 0x88a   :  { %1436 = vsyncpa [#allocation3], 1 }
 0x88b   :  { %1437 = vsyncpa [#allocation6], 1 }
 0x88c   :  { %1438 = vsyncpa [#allocation4], 1 }

</bundles_post_ra>
